<compile_context>
chip_gen: v7x
topology: tpu7x:2x2x1
jax: 0.10.0
libtpu: 0.0.40
codegen_flags: <defaults>
</compile_context>

<pallas_src>
import functools

import jax
import jax.numpy as jnp
from jax.experimental import pallas as pl
from jax.experimental.pallas import tpu as pltpu

BN_EPS = 1e-5

# Static geometry implied by the module.
H_IN, W_IN = 6, 7              # input spatial size (so the flatten is 192)
H1, W1 = H_IN - 2, W_IN - 2    # after conv1 (valid 3x3): 4, 5
H2, W2 = H1 - 2, W1 - 2        # after conv2 (valid 3x3): 2, 3
C1, C2 = 16, 32                # conv channel counts
FC = 32                        # fc hidden width
LANE = 128                     # lane-padded head output width

# Padded-window lengths: only rows feeding VALID outputs are ever read, so the
# per-(batch, tap) source slice stays inside the array for every batch.
WIN1 = (H1 - 1) * W_IN + W1    # 26
WIN2 = (H2 - 1) * W1 + W2      # 8

N_FLAT = H2 * W2 * C2          # 192
W2_ROWS = 9 * C1               # 144 rows of the weight slab hold conv2 taps


# ------------------------------------------------------------------ kernel ---

def cnn_fused_kernel(x_ref, wslab_ref, vslab_ref, o_ref):
    f32 = jnp.float32
    bf16 = jnp.bfloat16
    B = x_ref.shape[0] // (H_IN * W_IN)
    B_PAD = o_ref.shape[0]
    n1 = float(B * H1 * W1)
    n2 = float(B * H2 * W2)

    # Small per-channel vectors / folded bias from the single f32 slab.
    g1 = vslab_ref[0:1, 0:C1]
    be1 = vslab_ref[1:2, 0:C1]
    g2 = vslab_ref[2:3, 0:C2]
    be2 = vslab_ref[3:4, 0:C2]
    b_comb = vslab_ref[4:5, :]                      # [1, 128]

    # ---- conv1: in-kernel im2col-free taps (Cin == 1 -> rank-1 VPU FMAs) ----
    # acc1[b] covers rows r = h1*W_IN + w (w in [0,W_IN)); only w < W1 is valid
    # and only valid rows ever read in-range source data.
    acc1 = []
    for b in range(B):
        base = b * H_IN * W_IN
        a = None
        for k in range(9):
            i, j = divmod(k, 3)
            s0 = base + i * W_IN + j
            src = x_ref[s0:s0 + WIN1, :]                       # [26, 1] f32
            t = src * vslab_ref[5 + k:6 + k, 0:C1]             # [26, 16]
            a = t if a is None else a + t
        acc1.append(a)

    # Valid rows, ordered (b, h1, w1).  Conv bias omitted: a per-channel
    # constant is exactly cancelled by the train-mode BN mean subtraction.
    y1_pre = jnp.concatenate(
        [acc1[b][h1 * W_IN:h1 * W_IN + W1, :]
         for b in range(B) for h1 in range(H1)], axis=0)       # [B*20, 16]

    # Train-mode BN1 + ReLU, one-pass stats (E[x], E[x^2]).
    s1 = jnp.sum(y1_pre, axis=0, keepdims=True)
    q1 = jnp.sum(y1_pre * y1_pre, axis=0, keepdims=True)
    mu1 = s1 * (1.0 / n1)
    var1 = q1 * (1.0 / n1) - mu1 * mu1
    sc1 = g1 * jax.lax.rsqrt(var1 + BN_EPS)
    sh1 = be1 - mu1 * sc1
    y1 = jnp.maximum(y1_pre * sc1 + sh1, 0.0)                  # [B*20, 16] f32

    # ---- conv2: 9 bf16 MXU taps per sample over padded windows of y1 --------
    acc2 = []
    for b in range(B):
        base = b * H1 * W1
        a = None
        for k in range(9):
            i, j = divmod(k, 3)
            s0 = base + i * W1 + j
            lhs = y1[s0:s0 + WIN2, :].astype(bf16)             # [8, 16]
            rhs = wslab_ref[k * C1:(k + 1) * C1, 0:C2]         # [16, 32] bf16
            t = jnp.dot(lhs, rhs, preferred_element_type=f32)  # [8, 32] f32
            a = t if a is None else a + t
        acc2.append(a)

    # Valid rows, ordered (b, h2, w2).
    y2_pre = jnp.concatenate(
        [acc2[b][h2 * W1:h2 * W1 + W2, :]
         for b in range(B) for h2 in range(H2)], axis=0)       # [B*6, 32]

    # Train-mode BN2 + ReLU, one-pass stats.
    s2 = jnp.sum(y2_pre, axis=0, keepdims=True)
    q2 = jnp.sum(y2_pre * y2_pre, axis=0, keepdims=True)
    mu2 = s2 * (1.0 / n2)
    var2 = q2 * (1.0 / n2) - mu2 * mu2
    sc2 = g2 * jax.lax.rsqrt(var2 + BN_EPS)
    sh2 = be2 - mu2 * sc2
    y2 = jnp.maximum(y2_pre * sc2 + sh2, 0.0)                  # [B*6, 32] f32

    # ---- flatten to a lane-dense [B_PAD, 192] slab + folded fc@head ---------
    # (The PyTorch (C,H,W) flatten order is folded into the host-side layout
    #  of the combined weight matrix.)
    rows = []
    for b in range(B):
        rows.append(jnp.concatenate(
            [y2[b * H2 * W2 + s:b * H2 * W2 + s + 1, :] for s in range(H2 * W2)],
            axis=1))                                           # [1, 192]
    if B_PAD > B:
        rows.append(jnp.zeros((B_PAD - B, N_FLAT), f32))
    flat = jnp.concatenate(rows, axis=0).astype(bf16)          # [B_PAD, 192]

    wc = wslab_ref[W2_ROWS:W2_ROWS + N_FLAT, :]                # [192, 128] bf16
    # Single dense (8,128) store: one unmasked vst-width tile.
    o_ref[...] = jnp.dot(flat, wc, preferred_element_type=f32) + b_comb


# --------------------------------------------------------------- wrappers ---

def _vmem_spec():
    return pl.BlockSpec(memory_space=pltpu.MemorySpace.VMEM)


@functools.partial(jax.jit, static_argnames="n_out")
def cnn_forward(x, slab_w, slab_v, n_out):
    B = x.shape[0]
    b_pad = ((B + 7) // 8) * 8
    # Only host-side prep: a free (bitcast) reshape to (b, h, w) rows.
    x_rows = x.reshape(B * H_IN * W_IN, 1)
    out_padded = pl.pallas_call(
        cnn_fused_kernel,
        out_shape=jax.ShapeDtypeStruct((b_pad, LANE), jnp.float32),
        in_specs=[_vmem_spec(), _vmem_spec(), _vmem_spec()],
        out_specs=_vmem_spec(),
    )(x_rows, slab_w, slab_v)
    return out_padded[:B, :n_out]


def prepare_params(w1_t, w2_t, wfc_t, bfc, wh_t, bh, g1, be1, g2, be2, n_out):
    """One-time host-side weight re-layout (PyTorch shapes in, 2 packed slabs out).

    * conv biases intentionally dropped (cancelled by train-mode BN),
    * fc and head folded into one [192, 128] matrix + one [128] bias,
    * all matmul weights packed into ONE bf16 slab, all small vectors (BN
      affine params, folded bias, conv1 taps) into ONE f32 slab.
    """
    # conv1: [C1,1,3,3] -> [9(tap), C1]
    w1 = w1_t.reshape(C1, 9).T
    # conv2: [C2,C1,3,3] -> [(i,j,cin), C2]; tap k=(i*3+j) is rows k*C1 : +C1
    w2 = jnp.transpose(w2_t, (2, 3, 1, 0)).reshape(9 * C1, C2)
    # fc rows reordered to the kernel's (h2, w2, c2) lane order, then folded
    # with the head:  out = flat @ (Wfc^T Wh^T) + (bfc Wh^T + bh)
    wfc_mat = jnp.transpose(wfc_t.reshape(FC, C2, H2 * W2), (2, 1, 0)).reshape(N_FLAT, FC)
    w_comb = wfc_mat @ wh_t.T                                   # [192, n_out]
    b_comb = bfc @ wh_t.T + bh                                  # [n_out]

    # Weight slab (bf16): rows [0:144) conv2 taps, rows [144:336) folded fc+head.
    slab_w = jnp.zeros((W2_ROWS + N_FLAT, LANE), jnp.float32)
    slab_w = slab_w.at[0:W2_ROWS, 0:C2].set(w2)
    slab_w = slab_w.at[W2_ROWS:, 0:n_out].set(w_comb)
    slab_w = slab_w.astype(jnp.bfloat16)

    # Vector slab (f32): g1, be1, g2, be2, b_comb, then the 9 conv1 taps.
    slab_v = jnp.zeros((5 + 9, LANE), jnp.float32)
    slab_v = slab_v.at[0, 0:C1].set(g1)
    slab_v = slab_v.at[1, 0:C1].set(be1)
    slab_v = slab_v.at[2, 0:C2].set(g2)
    slab_v = slab_v.at[3, 0:C2].set(be2)
    slab_v = slab_v.at[4, 0:n_out].set(b_comb)
    slab_v = slab_v.at[5:14, 0:C1].set(w1)
    return slab_w, slab_v


# -------------------------------------------------- pure-JAX reference ------

def reference_forward(x, w1_t, b1, g1, be1, w2_t, b2, g2, be2, wfc_t, bfc, wh_t, bh):
    hp = jax.lax.Precision.HIGHEST

    def conv(v, w, b):
        y = jax.lax.conv_general_dilated(
            v, w, (1, 1), "VALID",
            dimension_numbers=("NCHW", "OIHW", "NCHW"), precision=hp)
        return y + b.reshape(1, -1, 1, 1)

    def bn_relu(y, g, be):
        mu = jnp.mean(y, axis=(0, 2, 3), keepdims=True)
        var = jnp.mean((y - mu) ** 2, axis=(0, 2, 3), keepdims=True)
        yn = (y - mu) * jax.lax.rsqrt(var + BN_EPS)
        return jnp.maximum(yn * g.reshape(1, -1, 1, 1) + be.reshape(1, -1, 1, 1), 0.0)

    y = bn_relu(conv(x, w1_t, b1), g1, be1)
    y = bn_relu(conv(y, w2_t, b2), g2, be2)
    flat = y.reshape(y.shape[0], -1)
    h = jnp.dot(flat, wfc_t.T, precision=hp) + bfc
    return jnp.dot(h, wh_t.T, precision=hp) + bh


# ------------------------------------------------------------------- main ---

if __name__ == "__main__":
    key = jax.random.PRNGKey(0)
    ks = jax.random.split(key, 13)

    n_out = 4          # number of actions for the DQN head
    B = 2

    # PyTorch-shaped synthetic parameters.
    w1_t = jax.random.normal(ks[0], (C1, 1, 3, 3), jnp.float32) * 0.1
    b1 = jax.random.normal(ks[1], (C1,), jnp.float32) * 0.1
    g1 = 1.0 + 0.1 * jax.random.normal(ks[2], (C1,), jnp.float32)
    be1 = 0.1 * jax.random.normal(ks[3], (C1,), jnp.float32)
    w2_t = jax.random.normal(ks[4], (C2, C1, 3, 3), jnp.float32) * 0.1
    b2 = jax.random.normal(ks[5], (C2,), jnp.float32) * 0.1
    g2 = 1.0 + 0.1 * jax.random.normal(ks[6], (C2,), jnp.float32)
    be2 = 0.1 * jax.random.normal(ks[7], (C2,), jnp.float32)
    wfc_t = jax.random.normal(ks[8], (FC, C2 * H2 * W2), jnp.float32) * 0.1
    bfc = jax.random.normal(ks[9], (FC,), jnp.float32) * 0.1
    wh_t = jax.random.normal(ks[10], (n_out, FC), jnp.float32) * 0.1
    bh = jax.random.normal(ks[11], (n_out,), jnp.float32) * 0.1

    # Input: NCHW, 1 channel, 6x7 spatial -> 192 flattened features after conv2.
    x = jax.random.normal(ks[12], (B, 1, H_IN, W_IN), jnp.float32)

    slab_w, slab_v = prepare_params(w1_t, w2_t, wfc_t, bfc, wh_t, bh,
                                    g1, be1, g2, be2, n_out)

    out = cnn_forward(x, slab_w, slab_v, n_out=n_out)
    jax.block_until_ready(out)
    assert out.shape == (B, n_out), out.shape
    assert out.dtype == jnp.float32

    # Correctness check against a pure-JAX NCHW reference (with conv biases and
    # the un-folded fc/head, demonstrating both folds are exact); tolerance
    # covers the bf16 matmul operands (f32 accumulation).
    ref = reference_forward(x, w1_t, b1, g1, be1, w2_t, b2, g2, be2,
                            wfc_t, bfc, wh_t, bh)
    err = float(jnp.max(jnp.abs(out - ref)))
    assert err < 3e-2, f"max abs error vs reference: {err}"

    print("KERNEL_OK")
</pallas_src>

<mosaic_0001>
module attributes {stable_mosaic.version = 11 : i64} {
  func.func @cnn_fused_kernel(%arg0: memref<84x1xf32, #tpu.memory_space<vmem>>, %arg1: memref<336x128xbf16, #tpu.memory_space<vmem>>, %arg2: memref<14x128xf32, #tpu.memory_space<vmem>>, %arg3: memref<8x128xf32, #tpu.memory_space<vmem>>) attributes {dimension_semantics = [], scalar_prefetch = 0 : i64, scratch_operands = 0 : i64, tpu.core_type = #tpu.core_type<tc>} {
    %c0 = arith.constant 0 : index
    %c0_0 = arith.constant 0 : index
    %0 = vector.load %arg2[%c0, %c0_0] : memref<14x128xf32, #tpu.memory_space<vmem>>, vector<1x16xf32>
    %c1 = arith.constant 1 : index
    %c0_1 = arith.constant 0 : index
    %1 = vector.load %arg2[%c1, %c0_1] : memref<14x128xf32, #tpu.memory_space<vmem>>, vector<1x16xf32>
    %c2 = arith.constant 2 : index
    %c0_2 = arith.constant 0 : index
    %2 = vector.load %arg2[%c2, %c0_2] : memref<14x128xf32, #tpu.memory_space<vmem>>, vector<1x32xf32>
    %c3 = arith.constant 3 : index
    %c0_3 = arith.constant 0 : index
    %3 = vector.load %arg2[%c3, %c0_3] : memref<14x128xf32, #tpu.memory_space<vmem>>, vector<1x32xf32>
    %c4 = arith.constant 4 : index
    %c0_4 = arith.constant 0 : index
    %4 = vector.load %arg2[%c4, %c0_4] : memref<14x128xf32, #tpu.memory_space<vmem>>, vector<1x128xf32>
    %c0_5 = arith.constant 0 : index
    %c0_6 = arith.constant 0 : index
    %5 = vector.load %arg0[%c0_5, %c0_6] : memref<84x1xf32, #tpu.memory_space<vmem>>, vector<26x1xf32>
    %c5 = arith.constant 5 : index
    %c0_7 = arith.constant 0 : index
    %6 = vector.load %arg2[%c5, %c0_7] : memref<14x128xf32, #tpu.memory_space<vmem>>, vector<1x16xf32>
    %7 = vector.broadcast %5 : vector<26x1xf32> to vector<26x16xf32>
    %8 = vector.broadcast %6 : vector<1x16xf32> to vector<26x16xf32>
    %9 = arith.mulf %7, %8 : vector<26x16xf32>
    %c1_8 = arith.constant 1 : index
    %c0_9 = arith.constant 0 : index
    %10 = vector.load %arg0[%c1_8, %c0_9] : memref<84x1xf32, #tpu.memory_space<vmem>>, vector<26x1xf32>
    %c6 = arith.constant 6 : index
    %c0_10 = arith.constant 0 : index
    %11 = vector.load %arg2[%c6, %c0_10] : memref<14x128xf32, #tpu.memory_space<vmem>>, vector<1x16xf32>
    %12 = vector.broadcast %10 : vector<26x1xf32> to vector<26x16xf32>
    %13 = vector.broadcast %11 : vector<1x16xf32> to vector<26x16xf32>
    %14 = arith.mulf %12, %13 : vector<26x16xf32>
    %15 = arith.addf %9, %14 : vector<26x16xf32>
    %c2_11 = arith.constant 2 : index
    %c0_12 = arith.constant 0 : index
    %16 = vector.load %arg0[%c2_11, %c0_12] : memref<84x1xf32, #tpu.memory_space<vmem>>, vector<26x1xf32>
    %c7 = arith.constant 7 : index
    %c0_13 = arith.constant 0 : index
    %17 = vector.load %arg2[%c7, %c0_13] : memref<14x128xf32, #tpu.memory_space<vmem>>, vector<1x16xf32>
    %18 = vector.broadcast %16 : vector<26x1xf32> to vector<26x16xf32>
    %19 = vector.broadcast %17 : vector<1x16xf32> to vector<26x16xf32>
    %20 = arith.mulf %18, %19 : vector<26x16xf32>
    %21 = arith.addf %15, %20 : vector<26x16xf32>
    %c7_14 = arith.constant 7 : index
    %c0_15 = arith.constant 0 : index
    %22 = vector.load %arg0[%c7_14, %c0_15] : memref<84x1xf32, #tpu.memory_space<vmem>>, vector<26x1xf32>
    %c8 = arith.constant 8 : index
    %c0_16 = arith.constant 0 : index
    %23 = vector.load %arg2[%c8, %c0_16] : memref<14x128xf32, #tpu.memory_space<vmem>>, vector<1x16xf32>
    %24 = vector.broadcast %22 : vector<26x1xf32> to vector<26x16xf32>
    %25 = vector.broadcast %23 : vector<1x16xf32> to vector<26x16xf32>
    %26 = arith.mulf %24, %25 : vector<26x16xf32>
    %27 = arith.addf %21, %26 : vector<26x16xf32>
    %c8_17 = arith.constant 8 : index
    %c0_18 = arith.constant 0 : index
    %28 = vector.load %arg0[%c8_17, %c0_18] : memref<84x1xf32, #tpu.memory_space<vmem>>, vector<26x1xf32>
    %c9 = arith.constant 9 : index
    %c0_19 = arith.constant 0 : index
    %29 = vector.load %arg2[%c9, %c0_19] : memref<14x128xf32, #tpu.memory_space<vmem>>, vector<1x16xf32>
    %30 = vector.broadcast %28 : vector<26x1xf32> to vector<26x16xf32>
    %31 = vector.broadcast %29 : vector<1x16xf32> to vector<26x16xf32>
    %32 = arith.mulf %30, %31 : vector<26x16xf32>
    %33 = arith.addf %27, %32 : vector<26x16xf32>
    %c9_20 = arith.constant 9 : index
    %c0_21 = arith.constant 0 : index
    %34 = vector.load %arg0[%c9_20, %c0_21] : memref<84x1xf32, #tpu.memory_space<vmem>>, vector<26x1xf32>
    %c10 = arith.constant 10 : index
    %c0_22 = arith.constant 0 : index
    %35 = vector.load %arg2[%c10, %c0_22] : memref<14x128xf32, #tpu.memory_space<vmem>>, vector<1x16xf32>
    %36 = vector.broadcast %34 : vector<26x1xf32> to vector<26x16xf32>
    %37 = vector.broadcast %35 : vector<1x16xf32> to vector<26x16xf32>
    %38 = arith.mulf %36, %37 : vector<26x16xf32>
    %39 = arith.addf %33, %38 : vector<26x16xf32>
    %c14 = arith.constant 14 : index
    %c0_23 = arith.constant 0 : index
    %40 = vector.load %arg0[%c14, %c0_23] : memref<84x1xf32, #tpu.memory_space<vmem>>, vector<26x1xf32>
    %c11 = arith.constant 11 : index
    %c0_24 = arith.constant 0 : index
    %41 = vector.load %arg2[%c11, %c0_24] : memref<14x128xf32, #tpu.memory_space<vmem>>, vector<1x16xf32>
    %42 = vector.broadcast %40 : vector<26x1xf32> to vector<26x16xf32>
    %43 = vector.broadcast %41 : vector<1x16xf32> to vector<26x16xf32>
    %44 = arith.mulf %42, %43 : vector<26x16xf32>
    %45 = arith.addf %39, %44 : vector<26x16xf32>
    %c15 = arith.constant 15 : index
    %c0_25 = arith.constant 0 : index
    %46 = vector.load %arg0[%c15, %c0_25] : memref<84x1xf32, #tpu.memory_space<vmem>>, vector<26x1xf32>
    %c12 = arith.constant 12 : index
    %c0_26 = arith.constant 0 : index
    %47 = vector.load %arg2[%c12, %c0_26] : memref<14x128xf32, #tpu.memory_space<vmem>>, vector<1x16xf32>
    %48 = vector.broadcast %46 : vector<26x1xf32> to vector<26x16xf32>
    %49 = vector.broadcast %47 : vector<1x16xf32> to vector<26x16xf32>
    %50 = arith.mulf %48, %49 : vector<26x16xf32>
    %51 = arith.addf %45, %50 : vector<26x16xf32>
    %c16 = arith.constant 16 : index
    %c0_27 = arith.constant 0 : index
    %52 = vector.load %arg0[%c16, %c0_27] : memref<84x1xf32, #tpu.memory_space<vmem>>, vector<26x1xf32>
    %c13 = arith.constant 13 : index
    %c0_28 = arith.constant 0 : index
    %53 = vector.load %arg2[%c13, %c0_28] : memref<14x128xf32, #tpu.memory_space<vmem>>, vector<1x16xf32>
    %54 = vector.broadcast %52 : vector<26x1xf32> to vector<26x16xf32>
    %55 = vector.broadcast %53 : vector<1x16xf32> to vector<26x16xf32>
    %56 = arith.mulf %54, %55 : vector<26x16xf32>
    %57 = arith.addf %51, %56 : vector<26x16xf32>
    %c42 = arith.constant 42 : index
    %c0_29 = arith.constant 0 : index
    %58 = vector.load %arg0[%c42, %c0_29] : memref<84x1xf32, #tpu.memory_space<vmem>>, vector<26x1xf32>
    %c5_30 = arith.constant 5 : index
    %c0_31 = arith.constant 0 : index
    %59 = vector.load %arg2[%c5_30, %c0_31] : memref<14x128xf32, #tpu.memory_space<vmem>>, vector<1x16xf32>
    %60 = vector.broadcast %58 : vector<26x1xf32> to vector<26x16xf32>
    %61 = vector.broadcast %59 : vector<1x16xf32> to vector<26x16xf32>
    %62 = arith.mulf %60, %61 : vector<26x16xf32>
    %c43 = arith.constant 43 : index
    %c0_32 = arith.constant 0 : index
    %63 = vector.load %arg0[%c43, %c0_32] : memref<84x1xf32, #tpu.memory_space<vmem>>, vector<26x1xf32>
    %c6_33 = arith.constant 6 : index
    %c0_34 = arith.constant 0 : index
    %64 = vector.load %arg2[%c6_33, %c0_34] : memref<14x128xf32, #tpu.memory_space<vmem>>, vector<1x16xf32>
    %65 = vector.broadcast %63 : vector<26x1xf32> to vector<26x16xf32>
    %66 = vector.broadcast %64 : vector<1x16xf32> to vector<26x16xf32>
    %67 = arith.mulf %65, %66 : vector<26x16xf32>
    %68 = arith.addf %62, %67 : vector<26x16xf32>
    %c44 = arith.constant 44 : index
    %c0_35 = arith.constant 0 : index
    %69 = vector.load %arg0[%c44, %c0_35] : memref<84x1xf32, #tpu.memory_space<vmem>>, vector<26x1xf32>
    %c7_36 = arith.constant 7 : index
    %c0_37 = arith.constant 0 : index
    %70 = vector.load %arg2[%c7_36, %c0_37] : memref<14x128xf32, #tpu.memory_space<vmem>>, vector<1x16xf32>
    %71 = vector.broadcast %69 : vector<26x1xf32> to vector<26x16xf32>
    %72 = vector.broadcast %70 : vector<1x16xf32> to vector<26x16xf32>
    %73 = arith.mulf %71, %72 : vector<26x16xf32>
    %74 = arith.addf %68, %73 : vector<26x16xf32>
    %c49 = arith.constant 49 : index
    %c0_38 = arith.constant 0 : index
    %75 = vector.load %arg0[%c49, %c0_38] : memref<84x1xf32, #tpu.memory_space<vmem>>, vector<26x1xf32>
    %c8_39 = arith.constant 8 : index
    %c0_40 = arith.constant 0 : index
    %76 = vector.load %arg2[%c8_39, %c0_40] : memref<14x128xf32, #tpu.memory_space<vmem>>, vector<1x16xf32>
    %77 = vector.broadcast %75 : vector<26x1xf32> to vector<26x16xf32>
    %78 = vector.broadcast %76 : vector<1x16xf32> to vector<26x16xf32>
    %79 = arith.mulf %77, %78 : vector<26x16xf32>
    %80 = arith.addf %74, %79 : vector<26x16xf32>
    %c50 = arith.constant 50 : index
    %c0_41 = arith.constant 0 : index
    %81 = vector.load %arg0[%c50, %c0_41] : memref<84x1xf32, #tpu.memory_space<vmem>>, vector<26x1xf32>
    %c9_42 = arith.constant 9 : index
    %c0_43 = arith.constant 0 : index
    %82 = vector.load %arg2[%c9_42, %c0_43] : memref<14x128xf32, #tpu.memory_space<vmem>>, vector<1x16xf32>
    %83 = vector.broadcast %81 : vector<26x1xf32> to vector<26x16xf32>
    %84 = vector.broadcast %82 : vector<1x16xf32> to vector<26x16xf32>
    %85 = arith.mulf %83, %84 : vector<26x16xf32>
    %86 = arith.addf %80, %85 : vector<26x16xf32>
    %c51 = arith.constant 51 : index
    %c0_44 = arith.constant 0 : index
    %87 = vector.load %arg0[%c51, %c0_44] : memref<84x1xf32, #tpu.memory_space<vmem>>, vector<26x1xf32>
    %c10_45 = arith.constant 10 : index
    %c0_46 = arith.constant 0 : index
    %88 = vector.load %arg2[%c10_45, %c0_46] : memref<14x128xf32, #tpu.memory_space<vmem>>, vector<1x16xf32>
    %89 = vector.broadcast %87 : vector<26x1xf32> to vector<26x16xf32>
    %90 = vector.broadcast %88 : vector<1x16xf32> to vector<26x16xf32>
    %91 = arith.mulf %89, %90 : vector<26x16xf32>
    %92 = arith.addf %86, %91 : vector<26x16xf32>
    %c56 = arith.constant 56 : index
    %c0_47 = arith.constant 0 : index
    %93 = vector.load %arg0[%c56, %c0_47] : memref<84x1xf32, #tpu.memory_space<vmem>>, vector<26x1xf32>
    %c11_48 = arith.constant 11 : index
    %c0_49 = arith.constant 0 : index
    %94 = vector.load %arg2[%c11_48, %c0_49] : memref<14x128xf32, #tpu.memory_space<vmem>>, vector<1x16xf32>
    %95 = vector.broadcast %93 : vector<26x1xf32> to vector<26x16xf32>
    %96 = vector.broadcast %94 : vector<1x16xf32> to vector<26x16xf32>
    %97 = arith.mulf %95, %96 : vector<26x16xf32>
    %98 = arith.addf %92, %97 : vector<26x16xf32>
    %c57 = arith.constant 57 : index
    %c0_50 = arith.constant 0 : index
    %99 = vector.load %arg0[%c57, %c0_50] : memref<84x1xf32, #tpu.memory_space<vmem>>, vector<26x1xf32>
    %c12_51 = arith.constant 12 : index
    %c0_52 = arith.constant 0 : index
    %100 = vector.load %arg2[%c12_51, %c0_52] : memref<14x128xf32, #tpu.memory_space<vmem>>, vector<1x16xf32>
    %101 = vector.broadcast %99 : vector<26x1xf32> to vector<26x16xf32>
    %102 = vector.broadcast %100 : vector<1x16xf32> to vector<26x16xf32>
    %103 = arith.mulf %101, %102 : vector<26x16xf32>
    %104 = arith.addf %98, %103 : vector<26x16xf32>
    %c58 = arith.constant 58 : index
    %c0_53 = arith.constant 0 : index
    %105 = vector.load %arg0[%c58, %c0_53] : memref<84x1xf32, #tpu.memory_space<vmem>>, vector<26x1xf32>
    %c13_54 = arith.constant 13 : index
    %c0_55 = arith.constant 0 : index
    %106 = vector.load %arg2[%c13_54, %c0_55] : memref<14x128xf32, #tpu.memory_space<vmem>>, vector<1x16xf32>
    %107 = vector.broadcast %105 : vector<26x1xf32> to vector<26x16xf32>
    %108 = vector.broadcast %106 : vector<1x16xf32> to vector<26x16xf32>
    %109 = arith.mulf %107, %108 : vector<26x16xf32>
    %110 = arith.addf %104, %109 : vector<26x16xf32>
    %111 = vector.extract_strided_slice %57 {offsets = [0, 0], sizes = [5, 16], strides = [1, 1]} : vector<26x16xf32> to vector<5x16xf32>
    %112 = vector.extract_strided_slice %57 {offsets = [7, 0], sizes = [5, 16], strides = [1, 1]} : vector<26x16xf32> to vector<5x16xf32>
    %113 = vector.extract_strided_slice %57 {offsets = [14, 0], sizes = [5, 16], strides = [1, 1]} : vector<26x16xf32> to vector<5x16xf32>
    %114 = vector.extract_strided_slice %57 {offsets = [21, 0], sizes = [5, 16], strides = [1, 1]} : vector<26x16xf32> to vector<5x16xf32>
    %115 = vector.extract_strided_slice %110 {offsets = [0, 0], sizes = [5, 16], strides = [1, 1]} : vector<26x16xf32> to vector<5x16xf32>
    %116 = vector.extract_strided_slice %110 {offsets = [7, 0], sizes = [5, 16], strides = [1, 1]} : vector<26x16xf32> to vector<5x16xf32>
    %117 = vector.extract_strided_slice %110 {offsets = [14, 0], sizes = [5, 16], strides = [1, 1]} : vector<26x16xf32> to vector<5x16xf32>
    %118 = vector.extract_strided_slice %110 {offsets = [21, 0], sizes = [5, 16], strides = [1, 1]} : vector<26x16xf32> to vector<5x16xf32>
    %119 = tpu.concatenate %111, %112, %113, %114, %115, %116, %117, %118 in 0 : vector<5x16xf32>, vector<5x16xf32>, vector<5x16xf32>, vector<5x16xf32>, vector<5x16xf32>, vector<5x16xf32>, vector<5x16xf32>, vector<5x16xf32> -> vector<40x16xf32>
    %cst = arith.constant dense<0.000000e+00> : vector<16xf32>
    %120 = vector.multi_reduction <add>, %119, %cst [0] : vector<40x16xf32> to vector<16xf32>
    %121 = vector.shape_cast %120 : vector<16xf32> to vector<1x16xf32>
    %122 = arith.mulf %119, %119 : vector<40x16xf32>
    %cst_56 = arith.constant dense<0.000000e+00> : vector<16xf32>
    %123 = vector.multi_reduction <add>, %122, %cst_56 [0] : vector<40x16xf32> to vector<16xf32>
    %124 = vector.shape_cast %123 : vector<16xf32> to vector<1x16xf32>
    %cst_57 = arith.constant 2.500000e-02 : f32
    %125 = vector.broadcast %cst_57 : f32 to vector<1x16xf32>
    %126 = arith.mulf %121, %125 : vector<1x16xf32>
    %cst_58 = arith.constant 2.500000e-02 : f32
    %127 = vector.broadcast %cst_58 : f32 to vector<1x16xf32>
    %128 = arith.mulf %124, %127 : vector<1x16xf32>
    %129 = arith.mulf %126, %126 : vector<1x16xf32>
    %130 = arith.subf %128, %129 : vector<1x16xf32>
    %cst_59 = arith.constant 9.99999974E-6 : f32
    %131 = vector.broadcast %cst_59 : f32 to vector<1x16xf32>
    %132 = arith.addf %130, %131 : vector<1x16xf32>
    %133 = math.rsqrt %132 : vector<1x16xf32>
    %134 = arith.mulf %0, %133 : vector<1x16xf32>
    %135 = arith.mulf %126, %134 : vector<1x16xf32>
    %136 = arith.subf %1, %135 : vector<1x16xf32>
    %137 = vector.broadcast %134 : vector<1x16xf32> to vector<40x16xf32>
    %138 = arith.mulf %119, %137 : vector<40x16xf32>
    %139 = vector.broadcast %136 : vector<1x16xf32> to vector<40x16xf32>
    %140 = arith.addf %138, %139 : vector<40x16xf32>
    %cst_60 = arith.constant 0.000000e+00 : f32
    %141 = vector.broadcast %cst_60 : f32 to vector<40x16xf32>
    %142 = arith.maximumf %140, %141 : vector<40x16xf32>
    %143 = vector.extract_strided_slice %142 {offsets = [0, 0], sizes = [8, 16], strides = [1, 1]} : vector<40x16xf32> to vector<8x16xf32>
    %144 = arith.truncf %143 : vector<8x16xf32> to vector<8x16xbf16>
    %c0_61 = arith.constant 0 : index
    %c0_62 = arith.constant 0 : index
    %145 = vector.load %arg1[%c0_61, %c0_62] : memref<336x128xbf16, #tpu.memory_space<vmem>>, vector<16x32xbf16>
    %cst_63 = arith.constant dense<0.000000e+00> : vector<8x32xf32>
    %146 = tpu.matmul %144, %145, %cst_63 {dimension_numbers = #tpu.dot_dimension_numbers<[1], [0], [0], [1], [0, 0, 1, 1], [], []>} : vector<8x16xbf16>, vector<16x32xbf16>, vector<8x32xf32> -> vector<8x32xf32>
    %147 = vector.extract_strided_slice %142 {offsets = [1, 0], sizes = [8, 16], strides = [1, 1]} : vector<40x16xf32> to vector<8x16xf32>
    %148 = arith.truncf %147 : vector<8x16xf32> to vector<8x16xbf16>
    %c16_64 = arith.constant 16 : index
    %c0_65 = arith.constant 0 : index
    %149 = vector.load %arg1[%c16_64, %c0_65] : memref<336x128xbf16, #tpu.memory_space<vmem>>, vector<16x32xbf16>
    %cst_66 = arith.constant dense<0.000000e+00> : vector<8x32xf32>
    %150 = tpu.matmul %148, %149, %cst_66 {dimension_numbers = #tpu.dot_dimension_numbers<[1], [0], [0], [1], [0, 0, 1, 1], [], []>} : vector<8x16xbf16>, vector<16x32xbf16>, vector<8x32xf32> -> vector<8x32xf32>
    %151 = arith.addf %146, %150 : vector<8x32xf32>
    %152 = vector.extract_strided_slice %142 {offsets = [2, 0], sizes = [8, 16], strides = [1, 1]} : vector<40x16xf32> to vector<8x16xf32>
    %153 = arith.truncf %152 : vector<8x16xf32> to vector<8x16xbf16>
    %c32 = arith.constant 32 : index
    %c0_67 = arith.constant 0 : index
    %154 = vector.load %arg1[%c32, %c0_67] : memref<336x128xbf16, #tpu.memory_space<vmem>>, vector<16x32xbf16>
    %cst_68 = arith.constant dense<0.000000e+00> : vector<8x32xf32>
    %155 = tpu.matmul %153, %154, %cst_68 {dimension_numbers = #tpu.dot_dimension_numbers<[1], [0], [0], [1], [0, 0, 1, 1], [], []>} : vector<8x16xbf16>, vector<16x32xbf16>, vector<8x32xf32> -> vector<8x32xf32>
    %156 = arith.addf %151, %155 : vector<8x32xf32>
    %157 = vector.extract_strided_slice %142 {offsets = [5, 0], sizes = [8, 16], strides = [1, 1]} : vector<40x16xf32> to vector<8x16xf32>
    %158 = arith.truncf %157 : vector<8x16xf32> to vector<8x16xbf16>
    %c48 = arith.constant 48 : index
    %c0_69 = arith.constant 0 : index
    %159 = vector.load %arg1[%c48, %c0_69] : memref<336x128xbf16, #tpu.memory_space<vmem>>, vector<16x32xbf16>
    %cst_70 = arith.constant dense<0.000000e+00> : vector<8x32xf32>
    %160 = tpu.matmul %158, %159, %cst_70 {dimension_numbers = #tpu.dot_dimension_numbers<[1], [0], [0], [1], [0, 0, 1, 1], [], []>} : vector<8x16xbf16>, vector<16x32xbf16>, vector<8x32xf32> -> vector<8x32xf32>
    %161 = arith.addf %156, %160 : vector<8x32xf32>
    %162 = vector.extract_strided_slice %142 {offsets = [6, 0], sizes = [8, 16], strides = [1, 1]} : vector<40x16xf32> to vector<8x16xf32>
    %163 = arith.truncf %162 : vector<8x16xf32> to vector<8x16xbf16>
    %c64 = arith.constant 64 : index
    %c0_71 = arith.constant 0 : index
    %164 = vector.load %arg1[%c64, %c0_71] : memref<336x128xbf16, #tpu.memory_space<vmem>>, vector<16x32xbf16>
    %cst_72 = arith.constant dense<0.000000e+00> : vector<8x32xf32>
    %165 = tpu.matmul %163, %164, %cst_72 {dimension_numbers = #tpu.dot_dimension_numbers<[1], [0], [0], [1], [0, 0, 1, 1], [], []>} : vector<8x16xbf16>, vector<16x32xbf16>, vector<8x32xf32> -> vector<8x32xf32>
    %166 = arith.addf %161, %165 : vector<8x32xf32>
    %167 = vector.extract_strided_slice %142 {offsets = [7, 0], sizes = [8, 16], strides = [1, 1]} : vector<40x16xf32> to vector<8x16xf32>
    %168 = arith.truncf %167 : vector<8x16xf32> to vector<8x16xbf16>
    %c80 = arith.constant 80 : index
    %c0_73 = arith.constant 0 : index
    %169 = vector.load %arg1[%c80, %c0_73] : memref<336x128xbf16, #tpu.memory_space<vmem>>, vector<16x32xbf16>
    %cst_74 = arith.constant dense<0.000000e+00> : vector<8x32xf32>
    %170 = tpu.matmul %168, %169, %cst_74 {dimension_numbers = #tpu.dot_dimension_numbers<[1], [0], [0], [1], [0, 0, 1, 1], [], []>} : vector<8x16xbf16>, vector<16x32xbf16>, vector<8x32xf32> -> vector<8x32xf32>
    %171 = arith.addf %166, %170 : vector<8x32xf32>
    %172 = vector.extract_strided_slice %142 {offsets = [10, 0], sizes = [8, 16], strides = [1, 1]} : vector<40x16xf32> to vector<8x16xf32>
    %173 = arith.truncf %172 : vector<8x16xf32> to vector<8x16xbf16>
    %c96 = arith.constant 96 : index
    %c0_75 = arith.constant 0 : index
    %174 = vector.load %arg1[%c96, %c0_75] : memref<336x128xbf16, #tpu.memory_space<vmem>>, vector<16x32xbf16>
    %cst_76 = arith.constant dense<0.000000e+00> : vector<8x32xf32>
    %175 = tpu.matmul %173, %174, %cst_76 {dimension_numbers = #tpu.dot_dimension_numbers<[1], [0], [0], [1], [0, 0, 1, 1], [], []>} : vector<8x16xbf16>, vector<16x32xbf16>, vector<8x32xf32> -> vector<8x32xf32>
    %176 = arith.addf %171, %175 : vector<8x32xf32>
    %177 = vector.extract_strided_slice %142 {offsets = [11, 0], sizes = [8, 16], strides = [1, 1]} : vector<40x16xf32> to vector<8x16xf32>
    %178 = arith.truncf %177 : vector<8x16xf32> to vector<8x16xbf16>
    %c112 = arith.constant 112 : index
    %c0_77 = arith.constant 0 : index
    %179 = vector.load %arg1[%c112, %c0_77] : memref<336x128xbf16, #tpu.memory_space<vmem>>, vector<16x32xbf16>
    %cst_78 = arith.constant dense<0.000000e+00> : vector<8x32xf32>
    %180 = tpu.matmul %178, %179, %cst_78 {dimension_numbers = #tpu.dot_dimension_numbers<[1], [0], [0], [1], [0, 0, 1, 1], [], []>} : vector<8x16xbf16>, vector<16x32xbf16>, vector<8x32xf32> -> vector<8x32xf32>
    %181 = arith.addf %176, %180 : vector<8x32xf32>
    %182 = vector.extract_strided_slice %142 {offsets = [12, 0], sizes = [8, 16], strides = [1, 1]} : vector<40x16xf32> to vector<8x16xf32>
    %183 = arith.truncf %182 : vector<8x16xf32> to vector<8x16xbf16>
    %c128 = arith.constant 128 : index
    %c0_79 = arith.constant 0 : index
    %184 = vector.load %arg1[%c128, %c0_79] : memref<336x128xbf16, #tpu.memory_space<vmem>>, vector<16x32xbf16>
    %cst_80 = arith.constant dense<0.000000e+00> : vector<8x32xf32>
    %185 = tpu.matmul %183, %184, %cst_80 {dimension_numbers = #tpu.dot_dimension_numbers<[1], [0], [0], [1], [0, 0, 1, 1], [], []>} : vector<8x16xbf16>, vector<16x32xbf16>, vector<8x32xf32> -> vector<8x32xf32>
    %186 = arith.addf %181, %185 : vector<8x32xf32>
    %187 = vector.extract_strided_slice %142 {offsets = [20, 0], sizes = [8, 16], strides = [1, 1]} : vector<40x16xf32> to vector<8x16xf32>
    %188 = arith.truncf %187 : vector<8x16xf32> to vector<8x16xbf16>
    %c0_81 = arith.constant 0 : index
    %c0_82 = arith.constant 0 : index
    %189 = vector.load %arg1[%c0_81, %c0_82] : memref<336x128xbf16, #tpu.memory_space<vmem>>, vector<16x32xbf16>
    %cst_83 = arith.constant dense<0.000000e+00> : vector<8x32xf32>
    %190 = tpu.matmul %188, %189, %cst_83 {dimension_numbers = #tpu.dot_dimension_numbers<[1], [0], [0], [1], [0, 0, 1, 1], [], []>} : vector<8x16xbf16>, vector<16x32xbf16>, vector<8x32xf32> -> vector<8x32xf32>
    %191 = vector.extract_strided_slice %142 {offsets = [21, 0], sizes = [8, 16], strides = [1, 1]} : vector<40x16xf32> to vector<8x16xf32>
    %192 = arith.truncf %191 : vector<8x16xf32> to vector<8x16xbf16>
    %c16_84 = arith.constant 16 : index
    %c0_85 = arith.constant 0 : index
    %193 = vector.load %arg1[%c16_84, %c0_85] : memref<336x128xbf16, #tpu.memory_space<vmem>>, vector<16x32xbf16>
    %cst_86 = arith.constant dense<0.000000e+00> : vector<8x32xf32>
    %194 = tpu.matmul %192, %193, %cst_86 {dimension_numbers = #tpu.dot_dimension_numbers<[1], [0], [0], [1], [0, 0, 1, 1], [], []>} : vector<8x16xbf16>, vector<16x32xbf16>, vector<8x32xf32> -> vector<8x32xf32>
    %195 = arith.addf %190, %194 : vector<8x32xf32>
    %196 = vector.extract_strided_slice %142 {offsets = [22, 0], sizes = [8, 16], strides = [1, 1]} : vector<40x16xf32> to vector<8x16xf32>
    %197 = arith.truncf %196 : vector<8x16xf32> to vector<8x16xbf16>
    %c32_87 = arith.constant 32 : index
    %c0_88 = arith.constant 0 : index
    %198 = vector.load %arg1[%c32_87, %c0_88] : memref<336x128xbf16, #tpu.memory_space<vmem>>, vector<16x32xbf16>
    %cst_89 = arith.constant dense<0.000000e+00> : vector<8x32xf32>
    %199 = tpu.matmul %197, %198, %cst_89 {dimension_numbers = #tpu.dot_dimension_numbers<[1], [0], [0], [1], [0, 0, 1, 1], [], []>} : vector<8x16xbf16>, vector<16x32xbf16>, vector<8x32xf32> -> vector<8x32xf32>
    %200 = arith.addf %195, %199 : vector<8x32xf32>
    %201 = vector.extract_strided_slice %142 {offsets = [25, 0], sizes = [8, 16], strides = [1, 1]} : vector<40x16xf32> to vector<8x16xf32>
    %202 = arith.truncf %201 : vector<8x16xf32> to vector<8x16xbf16>
    %c48_90 = arith.constant 48 : index
    %c0_91 = arith.constant 0 : index
    %203 = vector.load %arg1[%c48_90, %c0_91] : memref<336x128xbf16, #tpu.memory_space<vmem>>, vector<16x32xbf16>
    %cst_92 = arith.constant dense<0.000000e+00> : vector<8x32xf32>
    %204 = tpu.matmul %202, %203, %cst_92 {dimension_numbers = #tpu.dot_dimension_numbers<[1], [0], [0], [1], [0, 0, 1, 1], [], []>} : vector<8x16xbf16>, vector<16x32xbf16>, vector<8x32xf32> -> vector<8x32xf32>
    %205 = arith.addf %200, %204 : vector<8x32xf32>
    %206 = vector.extract_strided_slice %142 {offsets = [26, 0], sizes = [8, 16], strides = [1, 1]} : vector<40x16xf32> to vector<8x16xf32>
    %207 = arith.truncf %206 : vector<8x16xf32> to vector<8x16xbf16>
    %c64_93 = arith.constant 64 : index
    %c0_94 = arith.constant 0 : index
    %208 = vector.load %arg1[%c64_93, %c0_94] : memref<336x128xbf16, #tpu.memory_space<vmem>>, vector<16x32xbf16>
    %cst_95 = arith.constant dense<0.000000e+00> : vector<8x32xf32>
    %209 = tpu.matmul %207, %208, %cst_95 {dimension_numbers = #tpu.dot_dimension_numbers<[1], [0], [0], [1], [0, 0, 1, 1], [], []>} : vector<8x16xbf16>, vector<16x32xbf16>, vector<8x32xf32> -> vector<8x32xf32>
    %210 = arith.addf %205, %209 : vector<8x32xf32>
    %211 = vector.extract_strided_slice %142 {offsets = [27, 0], sizes = [8, 16], strides = [1, 1]} : vector<40x16xf32> to vector<8x16xf32>
    %212 = arith.truncf %211 : vector<8x16xf32> to vector<8x16xbf16>
    %c80_96 = arith.constant 80 : index
    %c0_97 = arith.constant 0 : index
    %213 = vector.load %arg1[%c80_96, %c0_97] : memref<336x128xbf16, #tpu.memory_space<vmem>>, vector<16x32xbf16>
    %cst_98 = arith.constant dense<0.000000e+00> : vector<8x32xf32>
    %214 = tpu.matmul %212, %213, %cst_98 {dimension_numbers = #tpu.dot_dimension_numbers<[1], [0], [0], [1], [0, 0, 1, 1], [], []>} : vector<8x16xbf16>, vector<16x32xbf16>, vector<8x32xf32> -> vector<8x32xf32>
    %215 = arith.addf %210, %214 : vector<8x32xf32>
    %216 = vector.extract_strided_slice %142 {offsets = [30, 0], sizes = [8, 16], strides = [1, 1]} : vector<40x16xf32> to vector<8x16xf32>
    %217 = arith.truncf %216 : vector<8x16xf32> to vector<8x16xbf16>
    %c96_99 = arith.constant 96 : index
    %c0_100 = arith.constant 0 : index
    %218 = vector.load %arg1[%c96_99, %c0_100] : memref<336x128xbf16, #tpu.memory_space<vmem>>, vector<16x32xbf16>
    %cst_101 = arith.constant dense<0.000000e+00> : vector<8x32xf32>
    %219 = tpu.matmul %217, %218, %cst_101 {dimension_numbers = #tpu.dot_dimension_numbers<[1], [0], [0], [1], [0, 0, 1, 1], [], []>} : vector<8x16xbf16>, vector<16x32xbf16>, vector<8x32xf32> -> vector<8x32xf32>
    %220 = arith.addf %215, %219 : vector<8x32xf32>
    %221 = vector.extract_strided_slice %142 {offsets = [31, 0], sizes = [8, 16], strides = [1, 1]} : vector<40x16xf32> to vector<8x16xf32>
    %222 = arith.truncf %221 : vector<8x16xf32> to vector<8x16xbf16>
    %c112_102 = arith.constant 112 : index
    %c0_103 = arith.constant 0 : index
    %223 = vector.load %arg1[%c112_102, %c0_103] : memref<336x128xbf16, #tpu.memory_space<vmem>>, vector<16x32xbf16>
    %cst_104 = arith.constant dense<0.000000e+00> : vector<8x32xf32>
    %224 = tpu.matmul %222, %223, %cst_104 {dimension_numbers = #tpu.dot_dimension_numbers<[1], [0], [0], [1], [0, 0, 1, 1], [], []>} : vector<8x16xbf16>, vector<16x32xbf16>, vector<8x32xf32> -> vector<8x32xf32>
    %225 = arith.addf %220, %224 : vector<8x32xf32>
    %226 = vector.extract_strided_slice %142 {offsets = [32, 0], sizes = [8, 16], strides = [1, 1]} : vector<40x16xf32> to vector<8x16xf32>
    %227 = arith.truncf %226 : vector<8x16xf32> to vector<8x16xbf16>
    %c128_105 = arith.constant 128 : index
    %c0_106 = arith.constant 0 : index
    %228 = vector.load %arg1[%c128_105, %c0_106] : memref<336x128xbf16, #tpu.memory_space<vmem>>, vector<16x32xbf16>
    %cst_107 = arith.constant dense<0.000000e+00> : vector<8x32xf32>
    %229 = tpu.matmul %227, %228, %cst_107 {dimension_numbers = #tpu.dot_dimension_numbers<[1], [0], [0], [1], [0, 0, 1, 1], [], []>} : vector<8x16xbf16>, vector<16x32xbf16>, vector<8x32xf32> -> vector<8x32xf32>
    %230 = arith.addf %225, %229 : vector<8x32xf32>
    %231 = vector.extract_strided_slice %186 {offsets = [0, 0], sizes = [3, 32], strides = [1, 1]} : vector<8x32xf32> to vector<3x32xf32>
    %232 = vector.extract_strided_slice %186 {offsets = [5, 0], sizes = [3, 32], strides = [1, 1]} : vector<8x32xf32> to vector<3x32xf32>
    %233 = vector.extract_strided_slice %230 {offsets = [0, 0], sizes = [3, 32], strides = [1, 1]} : vector<8x32xf32> to vector<3x32xf32>
    %234 = vector.extract_strided_slice %230 {offsets = [5, 0], sizes = [3, 32], strides = [1, 1]} : vector<8x32xf32> to vector<3x32xf32>
    %235 = tpu.concatenate %231, %232, %233, %234 in 0 : vector<3x32xf32>, vector<3x32xf32>, vector<3x32xf32>, vector<3x32xf32> -> vector<12x32xf32>
    %cst_108 = arith.constant dense<0.000000e+00> : vector<32xf32>
    %236 = vector.multi_reduction <add>, %235, %cst_108 [0] : vector<12x32xf32> to vector<32xf32>
    %237 = vector.shape_cast %236 : vector<32xf32> to vector<1x32xf32>
    %238 = arith.mulf %235, %235 : vector<12x32xf32>
    %cst_109 = arith.constant dense<0.000000e+00> : vector<32xf32>
    %239 = vector.multi_reduction <add>, %238, %cst_109 [0] : vector<12x32xf32> to vector<32xf32>
    %240 = vector.shape_cast %239 : vector<32xf32> to vector<1x32xf32>
    %cst_110 = arith.constant 0.0833333358 : f32
    %241 = vector.broadcast %cst_110 : f32 to vector<1x32xf32>
    %242 = arith.mulf %237, %241 : vector<1x32xf32>
    %cst_111 = arith.constant 0.0833333358 : f32
    %243 = vector.broadcast %cst_111 : f32 to vector<1x32xf32>
    %244 = arith.mulf %240, %243 : vector<1x32xf32>
    %245 = arith.mulf %242, %242 : vector<1x32xf32>
    %246 = arith.subf %244, %245 : vector<1x32xf32>
    %cst_112 = arith.constant 9.99999974E-6 : f32
    %247 = vector.broadcast %cst_112 : f32 to vector<1x32xf32>
    %248 = arith.addf %246, %247 : vector<1x32xf32>
    %249 = math.rsqrt %248 : vector<1x32xf32>
    %250 = arith.mulf %2, %249 : vector<1x32xf32>
    %251 = arith.mulf %242, %250 : vector<1x32xf32>
    %252 = arith.subf %3, %251 : vector<1x32xf32>
    %253 = vector.broadcast %250 : vector<1x32xf32> to vector<12x32xf32>
    %254 = arith.mulf %235, %253 : vector<12x32xf32>
    %255 = vector.broadcast %252 : vector<1x32xf32> to vector<12x32xf32>
    %256 = arith.addf %254, %255 : vector<12x32xf32>
    %cst_113 = arith.constant 0.000000e+00 : f32
    %257 = vector.broadcast %cst_113 : f32 to vector<12x32xf32>
    %258 = arith.maximumf %256, %257 : vector<12x32xf32>
    %259 = vector.extract_strided_slice %258 {offsets = [0, 0], sizes = [1, 32], strides = [1, 1]} : vector<12x32xf32> to vector<1x32xf32>
    %260 = vector.extract_strided_slice %258 {offsets = [1, 0], sizes = [1, 32], strides = [1, 1]} : vector<12x32xf32> to vector<1x32xf32>
    %261 = vector.extract_strided_slice %258 {offsets = [2, 0], sizes = [1, 32], strides = [1, 1]} : vector<12x32xf32> to vector<1x32xf32>
    %262 = vector.extract_strided_slice %258 {offsets = [3, 0], sizes = [1, 32], strides = [1, 1]} : vector<12x32xf32> to vector<1x32xf32>
    %263 = vector.extract_strided_slice %258 {offsets = [4, 0], sizes = [1, 32], strides = [1, 1]} : vector<12x32xf32> to vector<1x32xf32>
    %264 = vector.extract_strided_slice %258 {offsets = [5, 0], sizes = [1, 32], strides = [1, 1]} : vector<12x32xf32> to vector<1x32xf32>
    %265 = tpu.concatenate %259, %260, %261, %262, %263, %264 in 1 : vector<1x32xf32>, vector<1x32xf32>, vector<1x32xf32>, vector<1x32xf32>, vector<1x32xf32>, vector<1x32xf32> -> vector<1x192xf32>
    %266 = vector.extract_strided_slice %258 {offsets = [6, 0], sizes = [1, 32], strides = [1, 1]} : vector<12x32xf32> to vector<1x32xf32>
    %267 = vector.extract_strided_slice %258 {offsets = [7, 0], sizes = [1, 32], strides = [1, 1]} : vector<12x32xf32> to vector<1x32xf32>
    %268 = vector.extract_strided_slice %258 {offsets = [8, 0], sizes = [1, 32], strides = [1, 1]} : vector<12x32xf32> to vector<1x32xf32>
    %269 = vector.extract_strided_slice %258 {offsets = [9, 0], sizes = [1, 32], strides = [1, 1]} : vector<12x32xf32> to vector<1x32xf32>
    %270 = vector.extract_strided_slice %258 {offsets = [10, 0], sizes = [1, 32], strides = [1, 1]} : vector<12x32xf32> to vector<1x32xf32>
    %271 = vector.extract_strided_slice %258 {offsets = [11, 0], sizes = [1, 32], strides = [1, 1]} : vector<12x32xf32> to vector<1x32xf32>
    %272 = tpu.concatenate %266, %267, %268, %269, %270, %271 in 1 : vector<1x32xf32>, vector<1x32xf32>, vector<1x32xf32>, vector<1x32xf32>, vector<1x32xf32>, vector<1x32xf32> -> vector<1x192xf32>
    %cst_114 = arith.constant 0.000000e+00 : f32
    %273 = vector.broadcast %cst_114 : f32 to vector<6x192xf32>
    %274 = tpu.concatenate %265, %272, %273 in 0 : vector<1x192xf32>, vector<1x192xf32>, vector<6x192xf32> -> vector<8x192xf32>
    %275 = arith.truncf %274 : vector<8x192xf32> to vector<8x192xbf16>
    %c144 = arith.constant 144 : index
    %c0_115 = arith.constant 0 : index
    %276 = vector.load %arg1[%c144, %c0_115] : memref<336x128xbf16, #tpu.memory_space<vmem>>, vector<192x128xbf16>
    %cst_116 = arith.constant dense<0.000000e+00> : vector<8x128xf32>
    %277 = tpu.matmul %275, %276, %cst_116 {dimension_numbers = #tpu.dot_dimension_numbers<[1], [0], [0], [1], [0, 0, 1, 1], [], []>} : vector<8x192xbf16>, vector<192x128xbf16>, vector<8x128xf32> -> vector<8x128xf32>
    %278 = vector.broadcast %4 : vector<1x128xf32> to vector<8x128xf32>
    %279 = arith.addf %277, %278 : vector<8x128xf32>
    %c0_117 = arith.constant 0 : index
    %c0_118 = arith.constant 0 : index
    %280 = vector.load %arg3[%c0_117, %c0_118] : memref<8x128xf32, #tpu.memory_space<vmem>>, vector<8x128xf32>
    tpu.vector_store %arg3[%c0_117, %c0_118], %279 {strides = array<i32>} : memref<8x128xf32, #tpu.memory_space<vmem>>, vector<8x128xf32>,
    return
  }
}

</mosaic_0001>

<bundles_post_ra>
// kernel: cnn_forward.1
= control target key start
LH: loop header
LB: loop body
LE: loop exit
PB: predicated region body
PF: predicated region fallthrough
CT: control target
= control target key end

     0   :  { %8 = vsyncpa [#allocation3], 0  ;;  %s2268_s12 = smov [#allocation2]   ;;  %s2869_s0 = inlined_call_operand.vmem [shape: f32[84,1], index: 0, kind: input, shape index: {}]   ;;  %s2870_s1 = inlined_call_operand.hbm [shape: bf16[336,128], index: 1, kind: input, shape index: {}]   ;;  %s2871_s2 = inlined_call_operand.vmem [shape: f32[14,128], index: 2, kind: input, shape index: {}]   ;;  %s2872_s3 = inlined_call_operand.vmem [shape: f32[8,128], index: 3, kind: output, shape index: {}]  }
   0x1   :  { %s16_s13 = sshll.u32 %s2268_s12, 4  ;;  %s2244_s16 = scalar_lea.hbm %s2870_s1, 2688  ;;  %s17_s13 = int_to_ptr.vmem [resolvable:$true] %s16_s13 }
   0x2   :  { %p2245_p0 = scmp.ne.s32.totalorder %s2870_s1, %s2244_s16  ;;  %p2248_p1 = scmp.lt.u32.totalorder %s2244_s16, %s2870_s1 }
   0x4   :  { %p2250_p2 = pnand %p2248_p1, %p2245_p0 }
   0x6   :  { %2253 = shalt.err (!%p2250_p2)
}
   0x7   :  { %s2254_s21 = scalar_lea.vmem %s17_s13, 2688  ;;  %p2259_p4 = scmp.lt.s32.totalorder %s17_s13, %s17_s13 }
   0x8   :  { %p2255_p3 = scmp.ne.s32.totalorder %s17_s13, %s2254_s21  ;;  %p2260_p5 = scmp.lt.s32.totalorder %s2254_s21, %s2254_s21 }
   0xa   :  { %p2261_p6 = por %p2260_p5, %p2259_p4 }
   0xc   :  { %p2262_p7 = pnand %p2261_p6, %p2255_p3 }
   0xe   :  { %2265 = shalt.err (!%p2262_p7)
}
   0xf   :  { %s2269_s22 = smov 64   ;;  %s2270_s23 = smov 4  }
  0x10   :  { %22 = dma.hbm_to_vmem [thread:$0]  %s2870_s1, 2688, %s17_s13, [#allocation3], %s2269_s22, %s2269_s22, %s2270_s23  }
  0x11   :  { %2266 = dma.done.wait [#allocation3], 2688  }
  0x12   :  { %2267 = vsyncadd [#allocation3], 4294964608  ;;  %v2271_v0 = vmov 0   ;;  %v2315_v1 = vld [vmem:[%s2869_s0 + $0x9] sm:$0xff]  ;;  %v69_v3 = vld [vmem:[%s2869_s0 + $0x11] sm:$0xff]  ;;  %vm2273_vm0 = vmmov 0  }
  0x13   :  { %2208 = vset.pattern.permute.xlu1 %v2271_v0  ;;  %2207 = vset.pattern.permute.xlu0 %v2271_v0  ;;  %v35_v2 = vld [vmem:[%s2869_s0 + $0x8] sm:$0xff]  ;;  %v2327_v4 = vld [vmem:[%s2869_s0 + $0x10] sm:$0xff]  ;;  %v34_v6 = vld [vmem:[%s2869_s0] sm:$0xff]  ;;  %vm656_vm1 = vcmask 1043456   ;;  %vm662_vm2 = vcmask 1041408   ;;  %vm685_vm3 = vcmask 1046528  }
  0x14   :  { %79 = vperm.xlu1 %2208, %v2315_v1   ;;  %46 = vperm.xlu0 %2207, %v35_v2   ;;  %v67_v5 = vld [vmem:[%s2869_s0 + $0x1] sm:$0xff]  ;;  %v106_v7 = vld [vmem:[%s2869_s0 + $0x12] sm:$0xff]  ;;  %v105_v8 = vld [vmem:[%s2869_s0 + $0xa] sm:$0xff]  ;;  %vm649_vm4 = vcmask 1045504   ;;  %vm682_vm5 = vcmask 1044480   ;;  %vm693_vm6 = vcmask 130048  }
  0x15   :  { %v70_v9 = vld [vmem:[%s2869_s0 + $0x19] sm:$0x3]  ;;  %v2351_v11 = vld [vmem:[%s2869_s0 + $0xf] sm:$0xff]  ;;  %v104_v12 = vld [vmem:[%s2869_s0 + $0x2] sm:$0xff]  ;;  %vm688_vm7 = vcmask 1040384   ;;  %vm691_vm8 = vcmask 1042432  }
  0x16   :  { %v37_v10 = vld [vmem:[%s2869_s0 + $0x18] sm:$0x3]  ;;  %v363_v13 = vld [vmem:[%s2869_s0 + $0x2a] sm:$0xff]  ;;  %v107_v17 = vld [vmem:[%s2869_s0 + $0x1a] sm:$0x3]  ;;  %vm1692_vm9 = vcmask 261120  }
  0x17   :  { %v143_v14 = vld [vmem:[%s2869_s0 + $0x17] sm:$0xff]  ;;  %v391_v15 = vld [vmem:[%s2869_s0 + $0x2b] sm:$0xff]  ;;  %v144_v22 = vld [vmem:[%s2869_s0 + $0x1f] sm:$0x3]  ;;  %vm1694_vm10 = vcmask 257024   ;;  %s2274_s28 = smov 32  }
  0x18   :  { %84 = vperm.xlu1 %2208, %v69_v3   ;;  %51 = vperm.xlu0 %2207, %v2327_v4   ;;  %v364_v16 = vld [vmem:[%s2869_s0 + $0x32] sm:$0xff]  ;;  %v141_v19 = vld [vmem:[%s2869_s0 + $0x7] sm:$0xff]  ;;  %v2394_v24 = vld [vmem:[%s2869_s0 + $0x3a] sm:$0xff]  ;;  %s2275_s29 = smov 96   ;;  %vm1757_vm11 = vcmask 523264   ;;  %vm1759_vm12 = vcmask 785408  }
  0x19   :  { %v392_v18 = vld [vmem:[%s2869_s0 + $0x33] sm:$0xff]  ;;  %v393_v25 = vld [vmem:[%s2869_s0 + $0x3b] sm:$0xff]  ;;  %v394_v27 = vld [vmem:[%s2869_s0 + $0x43] sm:$0x3] }
  0x1a   :  { %v423_v20 = vld [vmem:[%s2869_s0 + $0x2c] sm:$0xff]  ;;  %v180_v21 = vld [vmem:[%s2869_s0 + $0x18] sm:$0xff]  ;;  %v366_v26 = vld [vmem:[%s2869_s0 + $0x42] sm:$0x3] }
  0x1b   :  { %v424_v23 = vld [vmem:[%s2869_s0 + $0x34] sm:$0xff]  ;;  %v181_v30 = vld [vmem:[%s2869_s0 + $0x20] sm:$0x3]  ;;  %v426_v34 = vld [vmem:[%s2869_s0 + $0x44] sm:$0x3] }
  0x1c   :  { %74 = vperm.xlu1 %2208, %v67_v5   ;;  %41 = vperm.xlu0 %2207, %v34_v6   ;;  %v455_v28 = vld [vmem:[%s2869_s0 + $0x31] sm:$0xff]  ;;  %v217_v29 = vld [vmem:[%s2869_s0 + $0x19] sm:$0xff]  ;;  %v218_v36 = vld [vmem:[%s2869_s0 + $0x21] sm:$0x3] }
  0x1d   :  { %v456_v31 = vld [vmem:[%s2869_s0 + $0x39] sm:$0xff]  ;;  %v457_v37 = vld [vmem:[%s2869_s0 + $0x41] sm:$0xff]  ;;  %v252_v38 = vld [vmem:[%s2869_s0 + $0xe] sm:$0xff] }
  0x1e   :  { %v425_v32 = vld [vmem:[%s2869_s0 + $0x3c] sm:$0xff]  ;;  %v458_v39 = vld [vmem:[%s2869_s0 + $0x49] sm:$0x3]  ;;  %v255_v41 = vld [vmem:[%s2869_s0 + $0x26] sm:$0x3] }
  0x1f   :  { %v253_v33 = vld [vmem:[%s2869_s0 + $0x16] sm:$0xff]  ;;  %v254_v35 = vld [vmem:[%s2869_s0 + $0x1e] sm:$0xff]  ;;  %v490_v43 = vld [vmem:[%s2869_s0 + $0x4a] sm:$0x3] }
  0x20   :  { %121 = vperm.xlu1 %2208, %v106_v7   ;;  %116 = vperm.xlu0 %2207, %v105_v8   ;;  %v291_v40 = vld [vmem:[%s2869_s0 + $0x1f] sm:$0xff]  ;;  %v292_v46 = vld [vmem:[%s2869_s0 + $0x27] sm:$0x3]  ;;  %v522_v49 = vld [vmem:[%s2869_s0 + $0x4b] sm:$0x3] }
  0x21   :  { %v489_v42 = vld [vmem:[%s2869_s0 + $0x42] sm:$0xff]  ;;  %v551_v44 = vld [vmem:[%s2869_s0 + $0x38] sm:$0xff]  ;;  %v554_v53 = vld [vmem:[%s2869_s0 + $0x50] sm:$0x3] }
  0x22   :  { %v328_v45 = vld [vmem:[%s2869_s0 + $0x20] sm:$0xff]  ;;  %v329_v50 = vld [vmem:[%s2869_s0 + $0x28] sm:$0x3]  ;;  %vm1991_vm13 = vmpackc.low %vm662_vm2, %vm662_vm2 }
  0x23   :  { %v552_v47 = vld [vmem:[%s2869_s0 + $0x40] sm:$0xff]  ;;  %v553_v54 = vld [vmem:[%s2869_s0 + $0x48] sm:$0xff] }
  0x24   :  { %89 = vperm.xlu1 %2208, %v70_v9   ;;  %56 = vperm.xlu0 %2207, %v37_v10   ;;  %v521_v48 = vld [vmem:[%s2869_s0 + $0x43] sm:$0xff]  ;;  %v618_v9 = vld [vmem:[%s2869_s0 + $0x52] sm:$0x3] }
  0x25   :  { %v2482_v51 = vld [vmem:[%s2871_s2 + $0x6] ss:$0 sm:$0xff]  ;;  %v2487_v52 = vld [vmem:[%s2871_s2 + $0x5] ss:$0 sm:$0xff]  ;;  %v2511_v8 = vld [vmem:[%s2871_s2 + $0x7] ss:$0 sm:$0xff] }
  0x26   :  { %v617_v10 = vld [vmem:[%s2869_s0 + $0x4a] sm:$0xff] }
  0x28   :  { %153 = vperm.xlu1 %2208, %v2351_v11   ;;  %111 = vperm.xlu0 %2207, %v104_v12  }
  0x2c   :  { %369 = vperm.xlu1 %2208, %v363_v13   ;;  %158 = vperm.xlu0 %2207, %v143_v14  }
  0x30   :  { %397 = vperm.xlu1 %2208, %v391_v15   ;;  %374 = vperm.xlu0 %2207, %v364_v16  }
  0x34   :  { %126 = vperm.xlu1 %2208, %v107_v17   ;;  %402 = vperm.xlu0 %2207, %v392_v18  }
  0x38   :  { %190 = vperm.xlu1 %2208, %v2327_v4   ;;  %148 = vperm.xlu0 %2207, %v141_v19  }
  0x3c   :  { %429 = vperm.xlu1 %2208, %v423_v20   ;;  %195 = vperm.xlu0 %2207, %v180_v21  }
  0x40   :  { %163 = vperm.xlu1 %2208, %v144_v22   ;;  %434 = vperm.xlu0 %2207, %v424_v23   ;;  %v2526_v22 = vld [vmem:[%s2871_s2 + $0x8] ss:$0 sm:$0xff] }
  0x44   :  { %379 = vperm.xlu1 %2208, %v2394_v24   ;;  %185 = vperm.xlu0 %2207, %v35_v2   ;;  %v585_v2 = vld [vmem:[%s2869_s0 + $0x49] sm:$0xff] }
  0x48   :  { %407 = vperm.xlu1 %2208, %v393_v25   ;;  %384 = vperm.xlu0 %2207, %v366_v26  }
  0x4c   :  { %227 = vperm.xlu1 %2208, %v69_v3   ;;  %412 = vperm.xlu0 %2207, %v394_v27  }
  0x50   :  { %461 = vperm.xlu1 %2208, %v455_v28   ;;  %232 = vperm.xlu0 %2207, %v217_v29  }
  0x54   :  { %200 = vperm.xlu1 %2208, %v181_v30   ;;  %466 = vperm.xlu0 %2207, %v456_v31  }
  0x58   :  { %439 = vperm.xlu1 %2208, %v425_v32   ;;  %222 = vperm.xlu0 %2207, %v2315_v1   ;;  %v586_v1 = vld [vmem:[%s2869_s0 + $0x51] sm:$0x3] }
  0x5c   :  { %264 = vperm.xlu1 %2208, %v253_v33   ;;  %444 = vperm.xlu0 %2207, %v426_v34  }
  0x60   :  { %493 = vperm.xlu1 %2208, %v364_v16   ;;  %269 = vperm.xlu0 %2207, %v254_v35  }
  0x64   :  { %237 = vperm.xlu1 %2208, %v218_v36   ;;  %498 = vperm.xlu0 %2207, %v2394_v24  }
  0x68   :  { %471 = vperm.xlu1 %2208, %v457_v37   ;;  %259 = vperm.xlu0 %2207, %v252_v38  }
  0x6c   :  { %301 = vperm.xlu1 %2208, %v143_v14   ;;  %476 = vperm.xlu0 %2207, %v458_v39  }
  0x70   :  { %525 = vperm.xlu1 %2208, %v392_v18   ;;  %306 = vperm.xlu0 %2207, %v291_v40  }
  0x74   :  { %274 = vperm.xlu1 %2208, %v255_v41   ;;  %530 = vperm.xlu0 %2207, %v393_v25  }
  0x78   :  { %503 = vperm.xlu1 %2208, %v489_v42   ;;  %296 = vperm.xlu0 %2207, %v2351_v11  }
  0x7c   :  { %338 = vperm.xlu1 %2208, %v180_v21   ;;  %508 = vperm.xlu0 %2207, %v490_v43  }
  0x80   :  { %557 = vperm.xlu1 %2208, %v551_v44   ;;  %343 = vperm.xlu0 %2207, %v328_v45   ;;  %v2539_v44 = vld [vmem:[%s2871_s2 + $0x9] ss:$0 sm:$0xff] }
  0x84   :  { %311 = vperm.xlu1 %2208, %v292_v46   ;;  %562 = vperm.xlu0 %2207, %v552_v47  }
  0x88   :  { %535 = vperm.xlu1 %2208, %v521_v48   ;;  %333 = vperm.xlu0 %2207, %v2327_v4  }
  0x8c   :  { %589 = vperm.xlu1 %2208, %v456_v31   ;;  %540 = vperm.xlu0 %2207, %v522_v49  }
  0x90   :  { %348 = vperm.xlu1 %2208, %v329_v50   ;;  %594 = vperm.xlu0 %2207, %v457_v37  }
  0x93   :  { %v80_v55 = vpop.permute.xlu1 %79  ;;  %v47_v56 = vpop.permute.xlu0 %46 }
  0x94   :  { %v97_v57 = vmul.f32 %v2482_v51, %v80_v55  ;;  %v64_v58 = vmul.f32 %v2487_v52, %v47_v56  ;;  %572 = vperm.xlu1 %2208, %v554_v53   ;;  %567 = vperm.xlu0 %2207, %v553_v54  }
  0x96   :  { %v101_v59 = vadd.f32 %v97_v57, %v64_v58 }
  0x97   :  { %v85_v60 = vpop.permute.xlu1 %84  ;;  %v52_v61 = vpop.permute.xlu0 %51 }
  0x98   :  { %v98_v62 = vmul.f32 %v2482_v51, %v85_v60  ;;  %v65_v63 = vmul.f32 %v2487_v52, %v52_v61  ;;  %626 = vperm.xlu1 %2208, %v489_v42   ;;  %621 = vperm.xlu0 %2207, %v2394_v24  }
  0x9a   :  { %v102_v3 = vadd.f32 %v98_v62, %v65_v63 }
  0x9b   :  { %v75_v4 = vpop.permute.xlu1 %74  ;;  %v42_v5 = vpop.permute.xlu0 %41 }
  0x9c   :  { %v96_v6 = vmul.f32 %v2482_v51, %v75_v4  ;;  %v63_v7 = vmul.f32 %v2487_v52, %v42_v5  ;;  %604 = vperm.xlu1 %2208, %v586_v1   ;;  %599 = vperm.xlu0 %2207, %v585_v2  }
  0x9e   :  { %v100_v11 = vadd.f32 %v96_v6, %v63_v7 }
  0x9f   :  { %v122_v12 = vpop.permute.xlu1 %121  ;;  %v117_v13 = vpop.permute.xlu0 %116 }
  0xa0   :  { %v135_v14 = vmul.f32 %v2511_v8, %v122_v12  ;;  %v134_v15 = vmul.f32 %v2511_v8, %v117_v13  ;;  %636 = vperm.xlu1 %2208, %v618_v9   ;;  %631 = vperm.xlu0 %2207, %v617_v10   ;;  %v2557_v13 = vld [vmem:[%s2871_s2 + $0xa] ss:$0 sm:$0xff] }
  0xa2   :  { %v139_v16 = vadd.f32 %v135_v14, %v102_v3  ;;  %v138_v17 = vadd.f32 %v134_v15, %v101_v59 }
  0xa3   :  { %v90_v18 = vpop.permute.xlu1 %89  ;;  %v57_v19 = vpop.permute.xlu0 %56 }
  0xa4   :  { %v99_v20 = vmul.f32 %v2482_v51, %v90_v18  ;;  %v66_v21 = vmul.f32 %v2487_v52, %v57_v19 }
  0xa6   :  { %v103_v23 = vadd.f32 %v99_v20, %v66_v21 }
  0xa7   :  { %v154_v24 = vpop.permute.xlu1 %153  ;;  %v112_v25 = vpop.permute.xlu0 %111 }
  0xa8   :  { %v171_v26 = vmul.f32 %v2526_v22, %v154_v24  ;;  %v133_v27 = vmul.f32 %v2511_v8, %v112_v25 }
  0xaa   :  { %v175_v28 = vadd.f32 %v171_v26, %v138_v17  ;;  %v137_v29 = vadd.f32 %v133_v27, %v100_v11 }
  0xab   :  { %v370_v30 = vpop.permute.xlu1 %369  ;;  %v159_v31 = vpop.permute.xlu0 %158 }
  0xac   :  { %v172_v32 = vmul.f32 %v2526_v22, %v159_v31  ;;  %v387_v36 = vmul.f32 %v2487_v52, %v370_v30 }
  0xae   :  { %v176_v33 = vadd.f32 %v172_v32, %v139_v16  ;;  %v2577_v32 = vld [vmem:[#allocation2 + $0x18] sm:$0xff]  }
  0xaf   :  { %v398_v34 = vpop.permute.xlu1 %397  ;;  %v375_v35 = vpop.permute.xlu0 %374 }
  0xb0   :  { %v415_v37 = vmul.f32 %v2482_v51, %v398_v34  ;;  %v388_v41 = vmul.f32 %v2487_v52, %v375_v35  ;;  %v2272_v35 = vmov 0.0  }
  0xb1   :  { %2030 = vmatprep.subr.bf16.mxu1 %v2272_v35  ;;  %2048 = vmatprep.subr.bf16.mxu0 %v2272_v35 }
  0xb2   :  { %v419_v38 = vadd.f32 %v415_v37, %v387_v36  ;;  %2049 = vmatpush3.bf16.msra.mxu0 %v2577_v32  ;;  %2032 = vmatprep.mubr.msk.bf16.mxu1 %vm2273_vm0, %v2272_v35 }
  0xb3   :  { %v127_v39 = vpop.permute.xlu1 %126  ;;  %v403_v40 = vpop.permute.xlu0 %402  ;;  %2050 = vmatprep.mubr.msk.bf16.mxu0 %vm2273_vm0, %v2272_v35  ;;  %2054 = vmatprep.subr.bf16.mxu0 %v2272_v35 }
  0xb4   :  { %v136_v42 = vmul.f32 %v2511_v8, %v127_v39  ;;  %v416_v43 = vmul.f32 %v2482_v51, %v403_v40 }
  0xb6   :  { %v140_v45 = vadd.f32 %v136_v42, %v103_v23  ;;  %v420_v46 = vadd.f32 %v416_v43, %v388_v41 }
  0xb7   :  { %v191_v47 = vpop.permute.xlu1 %190  ;;  %v149_v48 = vpop.permute.xlu0 %148 }
  0xb8   :  { %v208_v49 = vmul.f32 %v2539_v44, %v191_v47  ;;  %v170_v50 = vmul.f32 %v2526_v22, %v149_v48 }
  0xba   :  { %v212_v53 = vadd.f32 %v208_v49, %v175_v28  ;;  %v174_v54 = vadd.f32 %v170_v50, %v137_v29 }
  0xbb   :  { %v430_v55 = vpop.permute.xlu1 %429  ;;  %v196_v56 = vpop.permute.xlu0 %195 }
  0xbc   :  { %v447_v57 = vmul.f32 %v2511_v8, %v430_v55  ;;  %v209_v58 = vmul.f32 %v2539_v44, %v196_v56 }
  0xbe   :  { %v451_v59 = vadd.f32 %v447_v57, %v419_v38  ;;  %v213_v60 = vadd.f32 %v209_v58, %v176_v33  ;;  %v2617_v58 = vld [vmem:[%s2871_s2 + $0xd] ss:$0 sm:$0xff] }
  0xbf   :  { %v164_v61 = vpop.permute.xlu1 %163  ;;  %v435_v62 = vpop.permute.xlu0 %434 }
  0xc0   :  { %v173_v63 = vmul.f32 %v2526_v22, %v164_v61  ;;  %v448_v1 = vmul.f32 %v2511_v8, %v435_v62 }
  0xc2   :  { %v177_v2 = vadd.f32 %v173_v63, %v140_v45  ;;  %v2547_v3 = vadd.f32 %v448_v1, %v420_v46 }
  0xc3   :  { %v380_v4 = vpop.permute.xlu1 %379  ;;  %v186_v5 = vpop.permute.xlu0 %185 }
  0xc4   :  { %v207_v6 = vmul.f32 %v2539_v44, %v186_v5  ;;  %v389_v11 = vmul.f32 %v2487_v52, %v380_v4 }
  0xc6   :  { %v2550_v7 = vadd.f32 %v207_v6, %v174_v54  ;;  %v2609_v54 = vld [vmem:[%s2871_s2 + $0xc] ss:$0 sm:$0xff] }
  0xc7   :  { %v408_v9 = vpop.permute.xlu1 %407  ;;  %v385_v10 = vpop.permute.xlu0 %384 }
  0xc8   :  { %v417_v12 = vmul.f32 %v2482_v51, %v408_v9  ;;  %v390_v17 = vmul.f32 %v2487_v52, %v385_v10 }
  0xca   :  { %v2559_v14 = vadd.f32 %v417_v12, %v389_v11 }
  0xcb   :  { %v228_v15 = vpop.permute.xlu1 %227  ;;  %v413_v16 = vpop.permute.xlu0 %412 }
  0xcc   :  { %v245_v18 = vmul.f32 %v2557_v13, %v228_v15  ;;  %v418_v19 = vmul.f32 %v2482_v51, %v413_v16  ;;  %v2575_v51 = vld [vmem:[#allocation2 + $0x8] sm:$0xff]  }
  0xcd   :  { %2031 = vmatpush3.bf16.msra.mxu1 %v2575_v51 }
  0xce   :  { %v249_v20 = vadd.f32 %v245_v18, %v212_v53  ;;  %v2564_v21 = vadd.f32 %v418_v19, %v390_v17  ;;  %2036 = vmatprep.subr.bf16.mxu1 %v2272_v35  ;;  %v2604_v53 = vld [vmem:[%s2871_s2 + $0xb] ss:$0 sm:$0xff] }
  0xcf   :  { %v462_v23 = vpop.permute.xlu1 %461  ;;  %v233_v24 = vpop.permute.xlu0 %232 }
  0xd0   :  { %v479_v25 = vmul.f32 %v2526_v22, %v462_v23  ;;  %v246_v26 = vmul.f32 %v2557_v13, %v233_v24 }
  0xd2   :  { %v2568_v27 = vadd.f32 %v479_v25, %v451_v59  ;;  %v250_v28 = vadd.f32 %v246_v26, %v213_v60 }
  0xd3   :  { %v201_v29 = vpop.permute.xlu1 %200  ;;  %v2570_v30 = vpop.permute.xlu0 %466 }
  0xd4   :  { %v210_v52 = vmul.f32 %v2539_v44, %v201_v29 }
  0xd6   :  { %v2573_v31 = vadd.f32 %v210_v52, %v177_v2 }
  0xd7   :  { %v2579_v33 = vpop.permute.xlu1 %439  ;;  %v223_v34 = vpop.permute.xlu0 %222 }
  0xd8   :  { %v244_v10 = vmul.f32 %v2557_v13, %v223_v34 }
  0xdb   :  { %v265_v36 = vpop.permute.xlu1 %264  ;;  %v445_v37 = vpop.permute.xlu0 %444 }
  0xdc   :  { %v282_v57 = vmul.f32 %v2604_v53, %v265_v36 }
  0xde   :  { %v286_v63 = vadd.f32 %v282_v57, %v249_v20  ;;  %v248_v20 = vadd.f32 %v244_v10, %v2550_v7 }
  0xdf   :  { %v494_v38 = vpop.permute.xlu1 %493  ;;  %v270_v39 = vpop.permute.xlu0 %269 }
  0xe0   :  { %v283_v59 = vmul.f32 %v2604_v53, %v270_v39 }
  0xe2   :  { %v287_v4 = vadd.f32 %v283_v59, %v250_v28  ;;  %v450_v59 = vmul.f32 %v2511_v8, %v445_v37 }
  0xe3   :  { %v238_v40 = vpop.permute.xlu1 %237  ;;  %v2591_v41 = vpop.permute.xlu0 %498 }
  0xe4   :  { %v247_v34 = vmul.f32 %v2557_v13, %v238_v40  ;;  %v511_v40 = vmul.f32 %v2539_v44, %v494_v38  ;;  %v512_v37 = vmul.f32 %v2539_v44, %v2591_v41 }
  0xe7   :  { %v2593_v42 = vpop.permute.xlu1 %471  ;;  %v260_v43 = vpop.permute.xlu0 %259 }
  0xe8   :  { %v281_v16 = vmul.f32 %v2604_v53, %v260_v43 }
  0xea   :  { %v285_v28 = vadd.f32 %v281_v16, %v248_v20 }
  0xeb   :  { %v302_v45 = vpop.permute.xlu1 %301  ;;  %v2595_v46 = vpop.permute.xlu0 %476 }
  0xec   :  { %v319_v60 = vmul.f32 %v2609_v54, %v302_v45 }
  0xee   :  { %v323_v5 = vadd.f32 %v319_v60, %v286_v63 }
  0xef   :  { %v2597_v47 = vpop.permute.xlu1 %525  ;;  %v307_v48 = vpop.permute.xlu0 %306 }
  0xf0   :  { %v320_v1 = vmul.f32 %v2609_v54, %v307_v48 }
  0xf2   :  { %v324_v11 = vadd.f32 %v320_v1, %v287_v4 }
  0xf3   :  { %v275_v49 = vpop.permute.xlu1 %274  ;;  %v2599_v50 = vpop.permute.xlu0 %530 }
  0xf4   :  { %v284_v57 = vmul.f32 %v2604_v53, %v275_v49  ;;  %v454_v49 = vadd.f32 %v450_v59, %v2564_v21 }
  0xf7   :  { %v2611_v55 = vpop.permute.xlu1 %503  ;;  %v297_v56 = vpop.permute.xlu0 %296 }
  0xf8   :  { %v318_v23 = vmul.f32 %v2609_v54, %v297_v56  ;;  %v480_v56 = vmul.f32 %v2526_v22, %v2570_v30  ;;  %v449_v30 = vmul.f32 %v2511_v8, %v2579_v33  ;;  %v513_v59 = vmul.f32 %v2539_v44, %v2611_v55 }
  0xfa   :  { %v322_v7 = vadd.f32 %v318_v23, %v285_v28  ;;  %v481_v28 = vmul.f32 %v2526_v22, %v2593_v42 }
  0xfb   :  { %v339_v61 = vpop.permute.xlu1 %338  ;;  %v2621_v62 = vpop.permute.xlu0 %508 }
  0xfc   :  { %v356_v2 = vmul.f32 %v2617_v58, %v339_v61  ;;  %v251_v61 = vadd.f32 %v247_v34, %v2573_v31  ;;  %v515_v31 = vadd.f32 %v511_v40, %v2568_v27  ;;  %v514_v34 = vmul.f32 %v2539_v44, %v2621_v62 }
  0xfe   :  { %v360_v12 = vadd.f32 %v356_v2, %v323_v5  ;;  %v484_v5 = vadd.f32 %v480_v56, %v2547_v3  ;;  %v288_v38 = vadd.f32 %v284_v57, %v251_v61  ;;  %v544_v3 = vmul.f32 %v2557_v13, %v2599_v50 }
  0xff   :  { %v558_v6 = vpop.permute.xlu1 %557  ;;  %v344_v9 = vpop.permute.xlu0 %343  ;;  %v482_v50 = vmul.f32 %v2526_v22, %v2595_v46  ;;  %v453_v56 = vadd.f32 %v449_v30, %v2559_v14 }
 0x100   :  { %v357_v15 = vmul.f32 %v2617_v58, %v344_v9  ;;  %v657_v24 = vrot.slane %v360_v12, 4  ;;  %v651_v26 = vrot.slane %v360_v12, 2 }
 0x101   :  { %v486_v57 = vadd.f32 %v482_v50, %v454_v49 }
 0x102   :  { %v2628_v17 = vadd.f32 %v357_v15, %v324_v11  ;;  %v543_v11 = vmul.f32 %v2557_v13, %v2597_v47  ;;  %v516_v47 = vadd.f32 %v512_v37, %v484_v5 }
 0x103   :  { %v312_v18 = vpop.permute.xlu1 %311  ;;  %v563_v19 = vpop.permute.xlu0 %562  ;;  %v518_v61 = vadd.f32 %v514_v34, %v486_v57 }
 0x104   :  { %v658_v25 = vrot.slane %v2628_v17, 4  ;;  %v663_v52 = vrot.slane %v2628_v17, 6  ;;  %v321_v63 = vmul.f32 %v2609_v54, %v312_v18  ;;  %v575_v18 = vmul.f32 %v2604_v53, %v558_v6 }
 0x105   :  { %v576_v23 = vmul.f32 %v2604_v53, %v563_v19 }
 0x106   :  { %v659_v29 = vsel %vm656_vm1, %v657_v24, %v658_v25  ;;  %v325_v8 = vadd.f32 %v321_v63, %v288_v38 }
 0x107   :  { %v684_v36 = vsel %vm662_vm2, %v651_v26, %v659_v29  ;;  %v2637_v39 = vpop.permute.xlu1 %535  ;;  %v334_v43 = vpop.permute.xlu0 %333  ;;  %v547_v29 = vadd.f32 %v543_v11, %v515_v31 }
 0x108   :  { %v2641_v45 = vsel %vm685_vm3, %v684_v36, %v663_v52  ;;  %v355_v48 = vmul.f32 %v2617_v58, %v334_v43  ;;  %v545_v63 = vmul.f32 %v2557_v13, %v2637_v39 }
 0x109   :  { %v710_v9 = vmul.f32 %v2641_v45, %v2641_v45  ;;  %v695_v21 = vsel %vm693_vm6, %v2641_v45, 0.0  ;;  %v579_v42 = vadd.f32 %v575_v18, %v547_v29 }
 0x10a   :  { %v359_v60 = vadd.f32 %v355_v48, %v322_v7  ;;  %v548_v7 = vadd.f32 %v544_v3, %v516_v47 }
 0x10b   :  { %v590_v1 = vpop.permute.xlu1 %589  ;;  %v541_v2 = vpop.permute.xlu0 %540  ;;  %v715_v24 = vsel %vm693_vm6, %v710_v9, 0.0 }
 0x10c   :  { %v650_v4 = vrot.slane %v359_v60, 2  ;;  %v607_v6 = vmul.f32 %v2609_v54, %v590_v1  ;;  %v546_v22 = vmul.f32 %v2557_v13, %v541_v2  ;;  %v580_v40 = vadd.f32 %v576_v23, %v548_v7 }
 0x10e   :  { %v652_v10 = vsel %vm649_vm4, %v650_v4, %v651_v26  ;;  %v611_v5 = vadd.f32 %v607_v6, %v579_v42  ;;  %v550_v37 = vadd.f32 %v546_v22, %v518_v61 }
 0x10f   :  { %v2665_v33 = vsel %vm682_vm5, %v359_v60, %v652_v10  ;;  %v349_v41 = vpop.permute.xlu1 %348  ;;  %v595_v12 = vpop.permute.xlu0 %594  ;;  %v485_v60 = vadd.f32 %v481_v28, %v453_v56 }
 0x110   :  { %v694_v27 = vsel %vm693_vm6, %v2665_v33, 0.0  ;;  %v709_v15 = vmul.f32 %v2665_v33, %v2665_v33  ;;  %v358_v16 = vmul.f32 %v2617_v58, %v349_v41  ;;  %v608_v19 = vmul.f32 %v2609_v54, %v595_v12 }
 0x111   :  { %v696_v20 = vadd.f32 %v695_v21, %v694_v27  ;;  %v517_v2 = vadd.f32 %v513_v59, %v485_v60 }
 0x112   :  { %v714_v25 = vsel %vm693_vm6, %v709_v15, 0.0  ;;  %v362_v26 = vadd.f32 %v358_v16, %v325_v8  ;;  %v612_v30 = vadd.f32 %v608_v19, %v580_v40 }
 0x113   :  { %v716_v36 = vadd.f32 %v715_v24, %v714_v25  ;;  %v573_v43 = vpop.permute.xlu1 %572  ;;  %v568_v46 = vpop.permute.xlu0 %567  ;;  %v549_v49 = vadd.f32 %v545_v63, %v517_v2 }
 0x114   :  { %v664_v48 = vrot.slane %v362_v26, 6  ;;  %v578_v1 = vmul.f32 %v2604_v53, %v573_v43  ;;  %v577_v17 = vmul.f32 %v2604_v53, %v568_v46 }
 0x116   :  { %v665_v62 = vsel %vm662_vm2, %v663_v52, %v664_v48  ;;  %v582_v31 = vadd.f32 %v578_v1, %v550_v37  ;;  %v581_v8 = vadd.f32 %v577_v17, %v549_v49  ;;  %v738_v49 = vlaneseq }
 0x117   :  { %v627_v14 = vpop.permute.xlu1 %626  ;;  %v622_v4 = vpop.permute.xlu0 %621 }
 0x118   :  { %v640_v44 = vmul.f32 %v2617_v58, %v627_v14  ;;  %v639_v55 = vmul.f32 %v2617_v58, %v622_v4 }
 0x11a   :  { %v644_v52 = vadd.f32 %v640_v44, %v612_v30  ;;  %v643_v38 = vadd.f32 %v639_v55, %v611_v5 }
 0x11b   :  { %v605_v13 = vpop.permute.xlu1 %604  ;;  %v600_v39 = vpop.permute.xlu0 %599 }
 0x11c   :  { %v673_v9 = vrot.slane %v644_v52, 6  ;;  %v669_v10 = vrot.slane %v643_v38, 4  ;;  %v672_v11 = vrot.slane %v643_v38, 6  ;;  %v610_v3 = vmul.f32 %v2609_v54, %v605_v13  ;;  %v29_v13 = vld [vmem:[%s2871_s2] sm:$0x1] }
 0x11d   :  { %v609_v41 = vmul.f32 %v2609_v54, %v600_v39 }
 0x11e   :  { %v674_v12 = vsel %vm662_vm2, %v672_v11, %v673_v9  ;;  %v687_v21 = vsel %vm656_vm1, %v665_v62, %v669_v10  ;;  %v614_v53 = vadd.f32 %v610_v3, %v582_v31  ;;  %v739_v31 = vshrl.u32 %v738_v49, 7  ;;  %v30_v11 = vld [vmem:[%s2871_s2 + $0x1] sm:$0x1] }
 0x11f   :  { %v689_v27 = vsel %vm688_vm7, %v669_v10, %v674_v12  ;;  %v697_v15 = vsel %vm693_vm6, %v687_v21, 0.0  ;;  %v711_v16 = vmul.f32 %v687_v21, %v687_v21  ;;  %v613_v47 = vadd.f32 %v609_v41, %v581_v8  ;;  %v637_v50 = vpop.permute.xlu1 %636  ;;  %v632_v18 = vpop.permute.xlu0 %631 }
 0x120   :  { %v690_v23 = vsel %vm649_vm4, %v689_v27, %v644_v52  ;;  %v698_v24 = vadd.f32 %v697_v15, %v696_v20  ;;  %v642_v25 = vmul.f32 %v2617_v58, %v637_v50  ;;  %v641_v54 = vmul.f32 %v2617_v58, %v632_v18 }
 0x121   :  { %v712_v26 = vmul.f32 %v690_v23, %v690_v23  ;;  %v717_v28 = vsel %vm693_vm6, %v711_v16, 0.0  ;;  %v699_v29 = vsel %vm693_vm6, %v690_v23, 0.0  ;;  %v2718_v39 = vsub.s32 0, %v739_v31 }
 0x122   :  { %v718_v34 = vadd.f32 %v717_v28, %v716_v36  ;;  %v646_v43 = vadd.f32 %v642_v25, %v614_v53  ;;  %v700_v46 = vadd.f32 %v699_v29, %v698_v24  ;;  %v645_v7 = vadd.f32 %v641_v54, %v613_v47 }
 0x123   :  { %v719_v6 = vsel %vm693_vm6, %v712_v26, 0.0 }
 0x124   :  { %v679_v48 = vrot.slane %v646_v43, 2  ;;  %v720_v19 = vadd.f32 %v719_v6, %v718_v34  ;;  %v678_v56 = vrot.slane %v645_v7, 2 }
 0x126   :  { %v680_v20 = vsel %vm649_vm4, %v678_v56, %v679_v48  ;;  %v2221_v56 = vld [vmem:[#allocation2] sm:$0xff]  }
 0x127   :  { %v692_v57 = vsel %vm691_vm8, %v645_v7, %v680_v20  ;;  %v2736_v20 = vld [vmem:[#allocation2 + $0x20] sm:$0xff]  }
 0x128   :  { %v701_v58 = vsel %vm693_vm6, %v692_v57, 0.0  ;;  %v713_v59 = vmul.f32 %v692_v57, %v692_v57 }
 0x129   :  { %v702_v22 = vadd.f32 %v701_v58, %v700_v46 }
 0x12a   :  { %v721_v42 = vsel %vm693_vm6, %v713_v59, 0.0  ;;  %v2223_v59 = vld [vmem:[#allocation2 + $0x10] sm:$0xff]  }
 0x12b   :  { %v703_v36 = vrot.slane %v702_v22, 4  ;;  %v722_v40 = vadd.f32 %v721_v42, %v720_v19 }
 0x12d   :  { %v704_v62 = vadd.f32 %v703_v36, %v702_v22  ;;  %v723_v60 = vrot.slane %v722_v40, 4  ;;  %v2747_v22 = vld [vmem:[#allocation2 + $0x28] sm:$0xff]  }
 0x12f   :  { %v705_v61 = vrot.slane %v704_v62, 2  ;;  %v724_v63 = vadd.f32 %v723_v60, %v722_v40 }
 0x131   :  { %v706_v1 = vadd.f32 %v705_v61, %v704_v62  ;;  %v725_v14 = vrot.slane %v724_v63, 2 }
 0x133   :  { %v707_v4 = vrot.slane %v706_v1, 1  ;;  %v726_v5 = vadd.f32 %v725_v14, %v724_v63  ;;  %v2225_v14 = vld [vmem:[#allocation2 + $0x30] sm:$0xff]  }
 0x135   :  { %v708_v30 = vadd.f32 %v707_v4, %v706_v1  ;;  %v727_v44 = vrot.slane %v726_v5, 1 }
 0x137   :  { %v728_v55 = vadd.f32 %v727_v44, %v726_v5  ;;  %v729_v2 = vmul.f32 0.025, %v708_v30 }
 0x139   :  { %v730_v37 = vmul.f32 0.025, %v728_v55  ;;  %v731_v17 = vmul.f32 %v729_v2, %v729_v2 }
 0x13b   :  { %v732_v52 = vsub.f32 %v730_v37, %v731_v17 }
 0x13d   :  { %v733_v38 = vadd.f32 1e-05, %v732_v52 }
 0x13f   :  { %2240 = vrsqrt.f32 %v733_v38  ;;  %v2227_v38 = vld [vmem:[#allocation2 + $0x40] sm:$0xff]  }
 0x149   :  { %v2241_v9 = vpop.eup %2240 }
 0x14a   :  { %v735_v10 = vmul.f32 %v2241_v9, %v29_v13 }
 0x14c   :  { %v736_v3 = vmul.f32 %v735_v10, %v729_v2  ;;  %v741_v8 = vrot.slane %v735_v10, %v2718_v39 }
 0x14e   :  { %v737_v41 = vsub.f32 %v30_v11, %v736_v3  ;;  %v744_v12 = vmul.f32 %v741_v8, %v687_v21  ;;  %v745_v53 = vmul.f32 %v741_v8, %v690_v23  ;;  %v746_v27 = vmul.f32 %v741_v8, %v692_v57 }
 0x14f   :  { %v742_v15 = vmul.f32 %v741_v8, %v2665_v33  ;;  %v743_v16 = vmul.f32 %v741_v8, %v2641_v45 }
 0x150   :  { %v750_v47 = vrot.slane %v737_v41, %v2718_v39 }
 0x152   :  { %v753_v50 = vadd.f32 %v750_v47, %v744_v12  ;;  %v754_v18 = vadd.f32 %v750_v47, %v745_v53  ;;  %v755_v24 = vadd.f32 %v750_v47, %v746_v27  ;;  %v751_v25 = vadd.f32 %v750_v47, %v742_v15 }
 0x153   :  { %v752_v54 = vadd.f32 %v750_v47, %v743_v16 }
 0x154   :  { %v758_v26 = vmax.f32 %v753_v50, 0.0  ;;  %v759_v28 = vmax.f32 %v754_v18, 0.0  ;;  %v2727_v29 = vmax.f32 %v755_v24, 0.0  ;;  %v756_v34 = vmax.f32 %v751_v25, 0.0 }
 0x155   :  { %v757_v43 = vmax.f32 %v752_v54, 0.0 }
 0x156   :  { %v2729_v21 = vpack.c.bf16 %v759_v28, %v758_v26  ;;  %v2732_v23 = vpack.c.bf16 %v2727_v29, %v759_v28  ;;  %v761_v42 = vpack.c.bf16 %v756_v34, %v756_v34  ;;  %v1636_v47 = vpack.c.bf16 %v2727_v29, %v2727_v29  ;;  %v2231_v29 = vld [vmem:[#allocation2 + $0x60] sm:$0xff]  }
 0x157   :  { %v764_v33 = vpack.c.bf16 %v757_v43, %v756_v34  ;;  %v2734_v45 = vpack.c.bf16 %v758_v26, %v757_v43  ;;  %v2228_v43 = vld [vmem:[#allocation2 + $0x48] sm:$0xff]  }
 0x158   :  { %v1259_v63 = vshrl.u32 %v2729_v21, 16  ;;  %v1262_v1 = vshll.u32 %v2729_v21, 16  ;;  %v1310_v37 = vrot.slane %v2729_v21, 2  ;;  %v1354_v31 = vrot.slane %v2729_v21, 3 }
 0x159   :  { %v768_v46 = vshrl.u32 %v764_v33, 16  ;;  %v770_v7 = vshll.u32 %v764_v33, 16  ;;  %v983_v36 = vrot.slane %v764_v33, 3  ;;  %v875_v60 = vrot.slane %v764_v33, 1  ;;  %v2232_v33 = vld [vmem:[#allocation2 + $0x68] sm:$0xff]  }
 0x15a   :  { %v1261_v4 = vrot.slane %v1259_v63, 2  ;;  %v1264_v5 = vrot.slane %v1262_v1, 3  ;;  %v1093_v44 = vrot.slane %v2734_v45, 1  ;;  %v1147_v55 = vshrl.u32 %v2734_v45, 16 }
 0x15b   :  { %v772_v6 = vrot.slane %v770_v7, 1  ;;  %v928_v48 = vrot.slane %v768_v46, 2  ;;  %v929_v19 = vrot.slane %v770_v7, 3  ;;  %v1036_v40 = vrot.slane %v768_v46, 3 }
 0x15c   :  { %v1037_v62 = vrot.slane %v770_v7, 4  ;;  %v1265_v30 = vor.u32 %v1264_v5, %v1261_v4  ;;  %v1150_v2 = vshll.u32 %v2734_v45, 16  ;;  %v1149_v17 = vrot.slane %v1147_v55, 1  ;;  %v2235_v7 = vld [vmem:[#allocation2 + $0x80] sm:$0xff]  }
 0x15d   :  { %v773_v57 = vor.u32 %v772_v6, %v768_v46  ;;  %v930_v58 = vor.u32 %v929_v19, %v928_v48  ;;  %v1206_v13 = vrot.slane %v2734_v45, 2  ;;  %v1403_v9 = vshll.u32 %v2732_v23, 16  ;;  %v2233_v45 = vld [vmem:[#allocation2 + $0x70] sm:$0xff]   ;;  %v2234_v46 = vld [vmem:[#allocation2 + $0x78] sm:$0xff]   ;;  %v2236_v6 = vld [vmem:[#allocation2 + $0x88] sm:$0xff]  }
 0x15e   :  { %v1038_v61 = vor.u32 %v1037_v62, %v1036_v40  ;;  %v1152_v52 = vrot.slane %v1150_v2, 2  ;;  %v1401_v11 = vshrl.u32 %v2732_v23, 16  ;;  %v1544_v53 = vrot.slane %v2732_v23, 3 }
 0x15f   :  { %2033 = vmatmul.mubr.msk.bf16.vlgmr.msra.gmra.mrb[0].mxu1 %vm693_vm6, %v773_v57  ;;  %2051 = vmatmul.mubr.msk.bf16.vlgmr.msra.gmra.mrb[0].mxu0 %vm693_vm6, %v930_v58  ;;  %v1405_v10 = vrot.slane %v1403_v9, 1  ;;  %v1498_v41 = vrot.slane %v1403_v9, 2  ;;  %v1590_v15 = vrot.slane %v1403_v9, 4 }
 0x160   :  { %2037 = vmatpush3.bf16.msra.mxu1 %v2221_v56  ;;  %2055 = vmatpush3.bf16.msra.mxu0 %v2736_v20  ;;  %v1153_v49 = vor.u32 %v1152_v52, %v1149_v17  ;;  %v1497_v8 = vrot.slane %v1401_v11, 1  ;;  %v1589_v27 = vrot.slane %v1401_v11, 3 }
 0x161   :  { %2038 = vmatprep.mubr.msk.bf16.mxu1 %vm2273_vm0, %v2272_v35  ;;  %2042 = vmatprep.subr.bf16.mxu1 %v2272_v35  ;;  %v1406_v3 = vor.u32 %v1405_v10, %v1401_v11 }
 0x162   :  { %2056 = vmatprep.mubr.msk.bf16.mxu0 %vm2273_vm0, %v2272_v35  ;;  %2060 = vmatprep.subr.bf16.mxu0 %v2272_v35  ;;  %v1499_v12 = vor.u32 %v1498_v41, %v1497_v8  ;;  %v1591_v16 = vor.u32 %v1590_v15, %v1589_v27 }
 0x16b   :  { %2039 = vmatmul.mubr.msk.bf16.vlgmr.msra.gmra.mrb[0].mxu1 %vm693_vm6, %v761_v42  ;;  %2057 = vmatmul.mubr.msk.bf16.vlgmr.msra.gmra.mrb[0].mxu0 %vm693_vm6, %v983_v36 }
 0x16c   :  { %2043 = vmatpush3.bf16.msra.mxu1 %v2223_v59  ;;  %2061 = vmatpush3.bf16.msra.mxu0 %v2747_v22 }
 0x16d   :  { %2044 = vmatprep.mubr.msk.bf16.mxu1 %vm2273_vm0, %v2272_v35  ;;  %2062 = vmatprep.mubr.msk.bf16.mxu0 %vm2273_vm0, %v2272_v35 }
 0x16e   :  { %2084 = vmatprep.subr.bf16.mxu1 %v2272_v35  ;;  %2066 = vmatprep.subr.bf16.mxu0 %v2272_v35 }
 0x177   :  { %2045 = vmatmul.mubr.msk.bf16.vlgmr.msra.gmra.mrb[0].mxu1 %vm693_vm6, %v875_v60  ;;  %2063 = vmatmul.mubr.msk.bf16.vlgmr.msra.gmra.mrb[0].mxu0 %vm693_vm6, %v1038_v61 }
 0x178   :  { %2085 = vmatpush3.bf16.msra.mxu1 %v2575_v51  ;;  %2086 = vmatprep.mubr.msk.bf16.mxu1 %vm2273_vm0, %v2272_v35  ;;  %v2226_v51 = vld [vmem:[#allocation2 + $0x38] sm:$0xff]  }
 0x179   :  { %2090 = vmatprep.subr.bf16.mxu1 %v2272_v35  ;;  %2067 = vmatpush3.bf16.msra.mxu0 %v2225_v14 }
 0x17a   :  { %2068 = vmatprep.mubr.msk.bf16.mxu0 %vm2273_vm0, %v2272_v35  ;;  %2072 = vmatprep.subr.bf16.mxu0 %v2272_v35 }
 0x17f   :  { %2087 = vmatmul.mubr.msk.bf16.vlgmr.msra.gmra.mrb[4].mxu1 %vm693_vm6, %v1265_v30 }
 0x180   :  { %2091 = vmatpush3.bf16.msra.mxu1 %v2221_v56  ;;  %2092 = vmatprep.mubr.msk.bf16.mxu1 %vm2273_vm0, %v2272_v35 }
 0x181   :  { %2096 = vmatprep.subr.bf16.mxu1 %v2272_v35 }
 0x183   :  { %2069 = vmatmul.mubr.msk.bf16.vlgmr.msra.gmra.mrb[0].mxu0 %vm693_vm6, %v1093_v44 }
 0x184   :  { %2073 = vmatpush3.bf16.msra.mxu0 %v2226_v51  ;;  %2074 = vmatprep.mubr.msk.bf16.mxu0 %vm2273_vm0, %v2272_v35 }
 0x185   :  { %2078 = vmatprep.subr.bf16.mxu0 %v2272_v35 }
 0x18b   :  { %2093 = vmatmul.mubr.msk.bf16.vlgmr.msra.gmra.mrb[4].mxu1 %vm693_vm6, %v1310_v37 }
 0x18c   :  { %2097 = vmatpush3.bf16.msra.mxu1 %v2223_v59  ;;  %2098 = vmatprep.mubr.msk.bf16.mxu1 %vm2273_vm0, %v2272_v35 }
 0x18d   :  { %2102 = vmatprep.subr.bf16.mxu1 %v2272_v35 }
 0x18f   :  { %2075 = vmatmul.mubr.msk.bf16.vlgmr.msra.gmra.mrb[0].mxu0 %vm693_vm6, %v1153_v49 }
 0x190   :  { %2079 = vmatpush3.bf16.msra.mxu0 %v2227_v38  ;;  %2080 = vmatprep.mubr.msk.bf16.mxu0 %vm2273_vm0, %v2272_v35 }
 0x191   :  { %1895 = vmatprep.subr.bf16.mxu0 %v2271_v0 }
 0x197   :  { %2099 = vmatmul.mubr.msk.bf16.vlgmr.msra.gmra.mrb[4].mxu1 %vm693_vm6, %v1354_v31 }
 0x198   :  { %2103 = vmatpush3.bf16.msra.mxu1 %v2577_v32  ;;  %2104 = vmatprep.mubr.msk.bf16.mxu1 %vm2273_vm0, %v2272_v35  ;;  %v1452_v32 = vrot.slane %v2732_v23, 1  ;;  %v2229_v23 = vld [vmem:[#allocation2 + $0x50] sm:$0xff]  }
 0x199   :  { %2108 = vmatprep.subr.bf16.mxu1 %v2272_v35 }
 0x19b   :  { %2081 = vmatmul.mubr.msk.bf16.vlgmr.msra.gmra.mrb[0].mxu0 %vm693_vm6, %v1206_v13 }
 0x19c   :  { %1896 = vmatpush1.bf16.msra.mxu0 %v2228_v43 }
 0x19d   :  { %1897 = vmatprep.subr.bf16.mxu0 %v2271_v0 }
 0x1a0   :  { %1898 = vmatpush1.bf16.msra.mxu0 %v2229_v23 }
 0x1a1   :  { %1899 = vmatprep.subr.bf16.mxu0 %v2271_v0 }
 0x1a3   :  { %2105 = vmatmul.mubr.msk.bf16.vlgmr.msra.gmra.mrb[4].mxu1 %vm693_vm6, %v1406_v3 }
 0x1a4   :  { %2109 = vmatpush3.bf16.msra.mxu1 %v2736_v20  ;;  %2110 = vmatprep.mubr.msk.bf16.mxu1 %vm2273_vm0, %v2272_v35 }
 0x1a5   :  { %2114 = vmatprep.subr.bf16.mxu1 %v2272_v35 }
 0x1af   :  { %2111 = vmatmul.mubr.msk.bf16.vlgmr.msra.gmra.mrb[4].mxu1 %vm693_vm6, %v1452_v32  ;;  %v31_v32 = vld [vmem:[%s2871_s2 + $0x2] sm:$0x1] }
 0x1b0   :  { %2115 = vmatpush3.bf16.msra.mxu1 %v2747_v22  ;;  %2116 = vmatprep.mubr.msk.bf16.mxu1 %vm2273_vm0, %v2272_v35 }
 0x1b1   :  { %2120 = vmatprep.subr.bf16.mxu1 %v2272_v35 }
 0x1bb   :  { %2117 = vmatmul.mubr.msk.bf16.vlgmr.msra.gmra.mrb[4].mxu1 %vm693_vm6, %v1499_v12  ;;  %v32_v12 = vld [vmem:[%s2871_s2 + $0x3] sm:$0x1] }
 0x1bc   :  { %2121 = vmatpush3.bf16.msra.mxu1 %v2225_v14  ;;  %2122 = vmatprep.mubr.msk.bf16.mxu1 %vm2273_vm0, %v2272_v35 }
 0x1bd   :  { %2126 = vmatprep.subr.bf16.mxu1 %v2272_v35 }
 0x1c7   :  { %2123 = vmatmul.mubr.msk.bf16.vlgmr.msra.gmra.mrb[4].mxu1 %vm693_vm6, %v1544_v53 }
 0x1c8   :  { %2127 = vmatpush3.bf16.msra.mxu1 %v2226_v51  ;;  %2128 = vmatprep.mubr.msk.bf16.mxu1 %vm2273_vm0, %v2272_v35 }
 0x1c9   :  { %2132 = vmatprep.subr.bf16.mxu1 %v2272_v35 }
 0x1d3   :  { %2129 = vmatmul.mubr.msk.bf16.vlgmr.msra.gmra.mrb[4].mxu1 %vm693_vm6, %v1591_v16 }
 0x1d4   :  { %2133 = vmatpush3.bf16.msra.mxu1 %v2227_v38  ;;  %2134 = vmatprep.mubr.msk.bf16.mxu1 %vm2273_vm0, %v2272_v35  ;;  %v2230_v35 = vld [vmem:[#allocation2 + $0x58] sm:$0xff]  }
 0x1d5   :  { %1900 = vmatpush1.bf16.msra.mxu0 %v2230_v35  ;;  %v2239_v35 = vld [vmem:[#allocation2 + $0xa0] sm:$0xff]  }
 0x1d6   :  { %1901 = vmatprep.subr.bf16.mxu0 %v2271_v0 }
 0x1d9   :  { %1902 = vmatpush1.bf16.msra.mxu0 %v2231_v29 }
 0x1da   :  { %1903 = vmatprep.subr.bf16.mxu0 %v2271_v0 }
 0x1dd   :  { %1904 = vmatpush1.bf16.msra.mxu0 %v2232_v33 }
 0x1de   :  { %1905 = vmatprep.subr.bf16.mxu0 %v2271_v0 }
 0x1df   :  { %2135 = vmatmul.mubr.msk.bf16.vlgmr.msra.gmra.mrb[4].mxu1 %vm693_vm6, %v1636_v47 }
 0x1e1   :  { %1906 = vmatpush1.bf16.msra.mxu0 %v2233_v45 }
 0x1e2   :  { %1907 = vmatprep.subr.bf16.mxu0 %v2271_v0 }
 0x1e5   :  { %1908 = vmatpush1.bf16.msra.mxu0 %v2234_v46 }
 0x1e6   :  { %1909 = vmatprep.subr.bf16.mxu0 %v2271_v0 }
 0x1e9   :  { %1910 = vmatpush1.bf16.msra.mxu0 %v2235_v7 }
 0x1ea   :  { %1911 = vmatprep.subr.bf16.mxu0 %v2271_v0 }
 0x1ed   :  { %1912 = vmatpush1.bf16.msra.mxu0 %v2236_v6 }
 0x1ee   :  { %1913 = vmatprep.subr.bf16.mxu0 %v2271_v0 }
 0x24a   :  { %v919_v50 = vpop.f32.mrb[0].mxu1 }
 0x24b   :  { %v2046_v18 = vpop.f32.mrb[1].mxu1 }
 0x24c   :  { %v922_v24 = vpop.f32.mrb[2].mxu1  ;;  %v2237_v18 = vld [vmem:[#allocation2 + $0x90] sm:$0xff]  }
 0x24d   :  { %v2047_v25 = vpop.f32.mrb[3].mxu1  ;;  %1914 = vmatpush1.bf16.msra.mxu0 %v2237_v18 }
 0x24e   :  { %1915 = vmatprep.subr.bf16.mxu0 %v2271_v0 }
 0x26e   :  { %v1250_v54 = vpop.f32.mrb[0].mxu0 }
 0x26f   :  { %v2138_v26 = vadd.f32 %v1250_v54, %v919_v50  ;;  %v2082_v28 = vpop.f32.mrb[1].mxu0 }
 0x270   :  { %v1253_v34 = vpop.f32.mrb[2].mxu0  ;;  %v2238_v28 = vld [vmem:[#allocation2 + $0x98] sm:$0xff]  }
 0x271   :  { %v2083_v21 = vpop.f32.mrb[3].mxu0  ;;  %v1682_v48 = vrot.slane %v2138_v26, 2  ;;  %1916 = vmatpush1.bf16.msra.mxu0 %v2238_v28 }
 0x272   :  { %1917 = vmatprep.subr.bf16.mxu0 %v2271_v0 }
 0x273   :  { %v1689_v58 = vsel %vm691_vm8, %v2138_v26, %v1682_v48 }
 0x275   :  { %1918 = vmatpush1.bf16.msra.mxu0 %v2239_v35 }
 0x2b2   :  { %v1674_v19 = vpop.f32.mrb[4].mxu1 }
 0x2b3   :  { %v1685_v56 = vrot.slane %v1674_v19, 2  ;;  %v1687_v20 = vrot.slane %v1674_v19, 4  ;;  %v2136_v57 = vpop.f32.mrb[5].mxu1 }
 0x2b4   :  { %v1677_v59 = vpop.f32.mrb[6].mxu1 }
 0x2b5   :  { %v1690_v22 = vsel %vm649_vm4, %v1689_v58, %v1685_v56  ;;  %v1691_v42 = vsel %vm688_vm7, %v1685_v56, %v1687_v20  ;;  %v2137_v36 = vpop.f32.mrb[7].mxu1 }
 0x2b6   :  { %v1693_v40 = vsel %vm1692_vm9, %v1690_v22, 0.0  ;;  %v1695_v62 = vsel %vm1694_vm10, %v1691_v42, 0.0  ;;  %v1703_v60 = vmul.f32 %v1690_v22, %v1690_v22  ;;  %v1704_v61 = vmul.f32 %v1691_v42, %v1691_v42 }
 0x2b7   :  { %v1696_v63 = vadd.f32 %v1695_v62, %v1693_v40 }
 0x2b8   :  { %v1705_v1 = vsel %vm1692_vm9, %v1703_v60, 0.0  ;;  %v1706_v14 = vsel %vm1694_vm10, %v1704_v61, 0.0 }
 0x2b9   :  { %v1697_v4 = vrot.slane %v1696_v63, 4  ;;  %v1707_v5 = vadd.f32 %v1706_v14, %v1705_v1 }
 0x2bb   :  { %v1698_v30 = vadd.f32 %v1697_v4, %v1696_v63  ;;  %v1708_v51 = vrot.slane %v1707_v5, 4 }
 0x2bd   :  { %v1699_v44 = vrot.slane %v1698_v30, 2  ;;  %v1709_v55 = vadd.f32 %v1708_v51, %v1707_v5 }
 0x2bf   :  { %v1700_v2 = vadd.f32 %v1699_v44, %v1698_v30  ;;  %v1710_v37 = vrot.slane %v1709_v55, 2 }
 0x2c1   :  { %v1701_v17 = vrot.slane %v1700_v2, 1  ;;  %v1711_v52 = vadd.f32 %v1710_v37, %v1709_v55  ;;  %v1977_v55 = vld [vmem:[%s2871_s2 + $0x4] ss:$0 sm:$0xff] }
 0x2c3   :  { %v1702_v38 = vadd.f32 %v1701_v17, %v1700_v2  ;;  %v1712_v49 = vrot.slane %v1711_v52, 1 }
 0x2c5   :  { %v1713_v31 = vadd.f32 %v1712_v49, %v1711_v52  ;;  %v1714_v13 = vmul.f32 0.083333336, %v1702_v38 }
 0x2c7   :  { %v1715_v9 = vmul.f32 0.083333336, %v1713_v31  ;;  %v1716_v10 = vmul.f32 %v1714_v13, %v1714_v13 }
 0x2c9   :  { %v1717_v11 = vsub.f32 %v1715_v9, %v1716_v10 }
 0x2cb   :  { %v1718_v3 = vadd.f32 1e-05, %v1717_v11 }
 0x2cd   :  { %2242 = vrsqrt.f32 %v1718_v3 }
 0x2d7   :  { %v2243_v8 = vpop.eup %2242 }
 0x2d8   :  { %v1720_v41 = vmul.f32 %v2243_v8, %v31_v32 }
 0x2da   :  { %v1721_v53 = vmul.f32 %v1720_v41, %v1714_v13  ;;  %v1726_v27 = vrot.slane %v1720_v41, %v2718_v39 }
 0x2dc   :  { %v1722_v15 = vsub.f32 %v32_v12, %v1721_v53  ;;  %v1727_v16 = vmul.f32 %v1726_v27, %v1690_v22  ;;  %v1728_v47 = vmul.f32 %v1726_v27, %v1691_v42 }
 0x2de   :  { %v1732_v50 = vrot.slane %v1722_v15, %v2718_v39 }
 0x2e0   :  { %v1733_v24 = vadd.f32 %v1732_v50, %v1727_v16  ;;  %v1734_v25 = vadd.f32 %v1732_v50, %v1728_v47 }
 0x2e2   :  { %v1735_v54 = vmax.f32 %v1733_v24, 0.0  ;;  %v1736_v26 = vmax.f32 %v1734_v25, 0.0 }
 0x2e4   :  { %v1742_v34 = vrot.slane %v1735_v54, 2  ;;  %v1763_v43 = vrot.slane %v1736_v26, 2  ;;  %v1738_v21 = vrot.slane %v1735_v54, 1  ;;  %v1773_v23 = vrot.slane %v1736_v26, 5 }
 0x2e5   :  { %v1767_v39 = vrot.slane %v1736_v26, 3  ;;  %v1752_v45 = vrot.slane %v1735_v54, 5  ;;  %v1746_v46 = vrot.slane %v1735_v54, 3  ;;  %v1771_v0 = vrot.slane %v1736_v26, 4 }
 0x2e6   :  { %v2214_v29 = vpack.i.bf16 %v1742_v34, %v1763_v43  ;;  %v2209_v33 = vpack.i.bf16 %v1773_v23, %v1738_v21  ;;  %v1750_v58 = vrot.slane %v1735_v54, 4 }
 0x2e8   :  { %2215 = vrot.lane.b32.xlu1 %v2214_v29, %s2269_s22  ;;  %2210 = vrot.lane.b32.xlu0 %v2209_v33, %s2274_s28 }
 0x2ec   :  { %1768 = vrot.lane.b32.xlu1 %v1767_v39, %s2275_s29  ;;  %1753 = vrot.lane.b32.xlu0 %v1752_v45, %s2274_s28 }
 0x2f0   :  { %1747 = vrot.lane.b32.xlu0 %v1746_v46, %s2275_s29 }
 0x35a   :  { %v2216_v7 = vpop.permute.xlu1 %2215  ;;  %v2211_v6 = vpop.permute.xlu0 %2210 }
 0x35b   :  { %v2217_v48 = vunpack.i.l.bf16 %v2216_v7  ;;  %v2213_v19 = vunpack.i.h.bf16 %v2211_v6  ;;  %v2212_v56 = vunpack.i.l.bf16 %v2211_v6  ;;  %v2218_v59 = vunpack.i.h.bf16 %v2216_v7 }
 0x35d   :  { %v1779_v20 = vsel %vm1692_vm9, %v1771_v0, %v2213_v19  ;;  %v1756_v57 = vsel %vm1692_vm9, %v1735_v54, %v2212_v56 }
 0x35e   :  { %v1783_v22 = vrot.slane %v1779_v20, 5  ;;  %v1769_v42 = vpop.permute.xlu1 %1768  ;;  %v1777_v36 = vsel %vm1757_vm11, %v1756_v57, %v2217_v48  ;;  %v1754_v40 = vpop.permute.xlu0 %1753  ;;  %v1758_v5 = vsel %vm1757_vm11, %v1756_v57, %v2218_v59 }
 0x35f   :  { %v1778_v62 = vsel %vm1759_vm12, %v1777_v36, %v1769_v42  ;;  %v1761_v60 = vsel %vm1692_vm9, %v1750_v58, %v1754_v40 }
 0x360   :  { %v1787_v61 = vsel %vm688_vm7, %v1761_v60, %v1783_v22  ;;  %v1782_v1 = vrot.slane %v1778_v62, 5 }
 0x361   :  { %v1789_v63 = vsel %vm662_vm2, %v1787_v61, 0.0 }
 0x362   :  { %v1791_v14 = vpack.c.bf16 %v1789_v63, %v1789_v63  ;;  %v1748_v4 = vpop.permute.xlu0 %1747 }
 0x363   :  { %v1760_v30 = vsel %vm1759_vm12, %v1758_v5, %v1748_v4 }
 0x364   :  { %v1786_v51 = vsel %vm688_vm7, %v1760_v30, %v1782_v1  ;;  %1990 = vmatprep.mubr.msk.bf16.mxu0 %vm1757_vm11, %v1791_v14 }
 0x365   :  { %v1992_v44 = vpack.c.bf16 %v1786_v51, %v1786_v51 }
 0x367   :  { %1993 = vmatmul.mubr.msk.bf16.vlgmr.msra.gmra.mrb[4].mxu0 %vm1991_vm13, %v1992_v44 }
 0x43a   :  { %v1929_v2 = vpop.f32.mrb[4].mxu0 }
 0x43b   :  { %v1930_v37 = vadd.f32 %v1977_v55, %v1929_v2  ;;  %v1931_v17 = vpop.f32.mrb[5].mxu0 }
 0x43c   :  { %v1932_v52 = vpop.f32.mrb[6].mxu0 }
 0x43d   :  { %1935 = vst [vmem:[%s2872_s3] sm:$0xff] %v1930_v37  ;;  %v1933_v38 = vpop.f32.mrb[7].mxu0 }
 0x43e   :  { %1940 = vsyncpa [#allocation3], 1 }

</bundles_post_ra>
